<compile_context>
chip_gen: v5e
topology: v5e:2x2
jax: 0.10.0
libtpu: 0.0.40
codegen_flags: <defaults>
</compile_context>

<pallas_src>
import jax
import jax.numpy as jnp
from jax.experimental import pallas as pl
from jax.experimental.pallas import tpu as pltpu


def _arm_kernel(x_ref, wc_ref, b1_ref, wa_ref, b2_ref, o_ref):
    """One image per grid step.

    x_ref  : (1, H+2, W+2, C1p) bf16  zero-padded NHWC input (channels padded)
    wc_ref : (3, 3*C1p, C2p)    bf16  3x3 conv weight, BN1 scale folded;
                                      K index = kx*C1p + ci, grouped by ky
    b1_ref : (1, C2p)           f32   folded BN1 bias
    wa_ref : (C2p, C2p)         f32   1x1 attention weight (in, out), BN2 scale folded
    b2_ref : (1, C2p)           f32   folded BN2 bias
    o_ref  : (1, H*W, C2p)      bf16  lane-dense output (un-padded outside)
    """
    hp2, wp2, c1p = x_ref.shape[1], x_ref.shape[2], x_ref.shape[3]
    h, w = hp2 - 2, wp2 - 2
    k = 3 * c1p

    x = x_ref[0]                                          # (H+2, W+2, C1p)
    # Fold the 3 kx taps into the lane (channel) axis in VMEM (no HBM dup).
    xcol = jnp.concatenate(
        [x[:, 0:w, :], x[:, 1:w + 1, :], x[:, 2:w + 2, :]],
        axis=-1)                                          # (H+2, W, 3*C1p)

    # 3x3 conv as 3 bf16 MXU matmuls with K = 3*C1p; ky taps are leading-axis
    # slices (cheap: not the sublane/lane dims), accumulation in f32.
    acc = jnp.dot(xcol[0:h].reshape(h * w, k), wc_ref[0],
                  preferred_element_type=jnp.float32)
    acc += jnp.dot(xcol[1:h + 1].reshape(h * w, k), wc_ref[1],
                   preferred_element_type=jnp.float32)
    acc += jnp.dot(xcol[2:h + 2].reshape(h * w, k), wc_ref[2],
                   preferred_element_type=jnp.float32)

    # BN1 scale already folded into wc: only bias + ReLU here.
    fm = jnp.maximum(acc + b1_ref[...], 0.0)              # (H*W, C2p) f32

    # AdaptiveAvgPool2d(1): global spatial mean over the real H*W positions.
    pooled = jnp.mean(fm, axis=0, keepdims=True)          # (1, C2p) f32

    # 1x1 conv (no bias) with BN2 scale folded, + bias + sigmoid (f32, tiny).
    att = jax.nn.sigmoid(
        jnp.dot(pooled, wa_ref[...], preferred_element_type=jnp.float32)
        + b2_ref[...])                                     # (1, C2p)

    # channel-wise re-weighting; single lane-dense bf16 store.
    o_ref[0] = (fm * att).astype(o_ref.dtype)


def _round_up(x, m):
    return (x + m - 1) // m * m


def attention_refinement(x_nchw, params):
    """x_nchw: (N, C1, H, W) float32. Returns (N, C2, H, W) float32."""
    eps = 1e-5
    N, C1, H, W = x_nchw.shape
    C2 = params["w3"].shape[0]
    C1p = _round_up(C1, 128)   # lane-dense contraction dim
    C2p = _round_up(C2, 128)   # lane-dense output channel dim

    # Fold BatchNorms (eval mode): scales go into the weights, biases stay.
    inv1 = 1.0 / jnp.sqrt(params["bn1_v"] + eps)
    s1 = params["bn1_g"] * inv1
    b1 = params["bn1_b"] - params["bn1_m"] * s1
    inv2 = 1.0 / jnp.sqrt(params["bn2_v"] + eps)
    s2 = params["bn2_g"] * inv2
    b2 = params["bn2_b"] - params["bn2_m"] * s2

    # NCHW -> NHWC bf16 (cast fused into the transpose), spatial zero-pad by 1,
    # channel pad to C1p.  Single producer, no 3x duplicated column tensor.
    x = jnp.transpose(x_nchw, (0, 2, 3, 1)).astype(jnp.bfloat16)
    xpad = jnp.pad(x, ((0, 0), (1, 1), (1, 1), (0, C1p - C1)))   # (N,H+2,W+2,C1p)

    # conv3x3 weight (C2,C1,3,3) -> (ky,kx,ci,co); fold BN1 scale; pad; bf16.
    wc = jnp.transpose(params["w3"], (2, 3, 1, 0)) * s1[None, None, None, :]
    wc = jnp.pad(wc, ((0, 0), (0, 0), (0, C1p - C1), (0, C2p - C2)))
    wc = wc.reshape(3, 3 * C1p, C2p).astype(jnp.bfloat16)

    # 1x1 attention weight (C2,C2,1,1) -> (in,out); fold BN2 scale; pad; f32.
    wa = jnp.transpose(params["wa"][:, :, 0, 0], (1, 0)) * s2[None, :]
    wa = jnp.pad(wa, ((0, C2p - C2), (0, C2p - C2))).astype(jnp.float32)

    def _pad_row(v):
        return jnp.pad(v, (0, C2p - C2)).reshape(1, C2p).astype(jnp.float32)
    b1r, b2r = _pad_row(b1), _pad_row(b2)

    # Generation-aware VMEM budget (one image per step).
    blk_in = (H + 2) * (W + 2) * C1p * 2                     # bf16 input block
    blk_out = H * W * C2p * 2                                # bf16 output block
    blk_w = 9 * C1p * C2p * 2 + C2p * C2p * 4 + 2 * C2p * 4  # weights + biases
    live = ((H + 2) * W * 3 * C1p * 2       # in-VMEM kx-folded column
            + H * W * C2p * 4               # acc / fm
            + H * W * 3 * C1p * 2)          # one matmul lhs slab
    est = 2 * (blk_in + blk_out + blk_w) + live
    try:
        vmem_cap = int(pltpu.get_tpu_info().vmem_capacity_bytes)
    except Exception:
        vmem_cap = 64 << 20                 # conservative (v7x per-TensorCore)
    vmem_limit = int(min(int(0.85 * vmem_cap), max(32 << 20, 2 * est)))
    # TODO(synk): for very large H*W the whole-image-per-step block can exceed
    # v7x's 64 MiB VMEM; restructure into an H-tiled two-pass scheme then.

    out_flat = pl.pallas_call(
        _arm_kernel,
        out_shape=jax.ShapeDtypeStruct((N, H * W, C2p), jnp.bfloat16),
        grid_spec=pltpu.PrefetchScalarGridSpec(
            num_scalar_prefetch=0,
            grid=(N,),   # one image per step: max grid steps for megacore/pipelining
            in_specs=[
                pl.BlockSpec((1, H + 2, W + 2, C1p), lambda n: (n, 0, 0, 0)),
                pl.BlockSpec((3, 3 * C1p, C2p), lambda n: (0, 0, 0)),
                pl.BlockSpec((1, C2p), lambda n: (0, 0)),
                pl.BlockSpec((C2p, C2p), lambda n: (0, 0)),
                pl.BlockSpec((1, C2p), lambda n: (0, 0)),
            ],
            out_specs=pl.BlockSpec((1, H * W, C2p), lambda n: (n, 0, 0)),
        ),
        compiler_params=pltpu.CompilerParams(
            dimension_semantics=("parallel",),
            vmem_limit_bytes=vmem_limit),
    )(xpad, wc, b1r, wa, b2r)
    # TODO(synk): the constant operands (wc/wa/biases) never re-DMA; marking
    # them pipeline_mode=pl.Buffered(1) would free their second VMEM buffer.

    # un-pad channels, cast back to f32, restore NCHW (fused into one XLA pass).
    out = out_flat.reshape(N, H, W, C2p)[:, :, :, :C2].astype(jnp.float32)
    return jnp.transpose(out, (0, 3, 1, 2))


def _reference(x_nchw, params):
    """Pure-JAX f32 reference (mirrors the PyTorch forward in eval mode)."""
    eps = 1e-5
    w3, wa = params["w3"], params["wa"]
    s1 = params["bn1_g"] / jnp.sqrt(params["bn1_v"] + eps)
    b1 = params["bn1_b"] - params["bn1_m"] * s1
    s2 = params["bn2_g"] / jnp.sqrt(params["bn2_v"] + eps)
    b2 = params["bn2_b"] - params["bn2_m"] * s2

    fm = jax.lax.conv_general_dilated(
        x_nchw, w3, window_strides=(1, 1), padding=((1, 1), (1, 1)),
        dimension_numbers=("NCHW", "OIHW", "NCHW"))
    fm = jnp.maximum(fm * s1[None, :, None, None] + b1[None, :, None, None], 0.0)

    pooled = jnp.mean(fm, axis=(2, 3), keepdims=True)
    att = jax.lax.conv_general_dilated(
        pooled, wa, window_strides=(1, 1), padding="VALID",
        dimension_numbers=("NCHW", "OIHW", "NCHW"))
    att = jax.nn.sigmoid(att * s2[None, :, None, None] + b2[None, :, None, None])
    return fm * att


def make_params(key, c1, c2):
    ks = jax.random.split(key, 6)
    return {
        "w3": 0.1 * jax.random.normal(ks[0], (c2, c1, 3, 3), jnp.float32),
        "bn1_g": 1.0 + 0.1 * jax.random.normal(ks[1], (c2,), jnp.float32),
        "bn1_b": 0.1 * jax.random.normal(ks[2], (c2,), jnp.float32),
        "bn1_m": 0.05 * jax.random.normal(ks[3], (c2,), jnp.float32),
        "bn1_v": jnp.abs(jax.random.normal(ks[4], (c2,), jnp.float32)) + 0.5,
        "wa": 0.1 * jax.random.normal(ks[5], (c2, c2, 1, 1), jnp.float32),
        "bn2_g": jnp.ones((c2,), jnp.float32),
        "bn2_b": jnp.zeros((c2,), jnp.float32),
        "bn2_m": jnp.zeros((c2,), jnp.float32),
        "bn2_v": jnp.ones((c2,), jnp.float32),
    }


if __name__ == "__main__":
    N, C1, C2, H, W = 2, 4, 8, 16, 16
    key = jax.random.PRNGKey(0)
    kx, kp = jax.random.split(key)
    x = jax.random.normal(kx, (N, C1, H, W), jnp.float32)
    params = make_params(kp, C1, C2)

    out = jax.block_until_ready(attention_refinement(x, params))
    ref = jax.block_until_ready(_reference(x, params))

    assert out.shape == (N, C2, H, W)
    # bf16 MXU operands / bf16 output (f32 accumulation) -> relaxed tolerance.
    assert jnp.allclose(out, ref, atol=3e-2, rtol=3e-2), "mismatch vs JAX reference"
    print("KERNEL_OK")
</pallas_src>

<mosaic_0001>
module attributes {stable_mosaic.version = 11 : i64} {
  func.func @_arm_kernel(%arg0: i32, %arg1: memref<1x18x18x128xbf16, #tpu.memory_space<vmem>>, %arg2: memref<3x384x128xbf16, #tpu.memory_space<vmem>>, %arg3: memref<1x128xf32, #tpu.memory_space<vmem>>, %arg4: memref<128x128xf32, #tpu.memory_space<vmem>>, %arg5: memref<1x128xf32, #tpu.memory_space<vmem>>, %arg6: memref<1x256x128xbf16, #tpu.memory_space<vmem>>) attributes {dimension_semantics = [#tpu.dimension_semantics<parallel>], iteration_bounds = array<i64: 2>, scalar_prefetch = 0 : i64, scratch_operands = 0 : i64, tpu.core_type = #tpu.core_type<tc>, window_params = [{transform_indices = @transform_0, window_bounds = array<i64: 1, 18, 18, 128>}, {pipeline_mode = #tpu.pipeline_mode<synchronous>, transform_indices = @transform_1, window_bounds = array<i64: 3, 384, 128>}, {pipeline_mode = #tpu.pipeline_mode<synchronous>, transform_indices = @transform_2, window_bounds = array<i64: 1, 128>}, {pipeline_mode = #tpu.pipeline_mode<synchronous>, transform_indices = @transform_3, window_bounds = array<i64: 128, 128>}, {pipeline_mode = #tpu.pipeline_mode<synchronous>, transform_indices = @transform_4, window_bounds = array<i64: 1, 128>}, {transform_indices = @transform_5, window_bounds = array<i64: 1, 256, 128>}]} {
    %c0 = arith.constant 0 : index
    %c0_0 = arith.constant 0 : index
    %c0_1 = arith.constant 0 : index
    %c0_2 = arith.constant 0 : index
    %0 = vector.load %arg1[%c0, %c0_0, %c0_1, %c0_2] : memref<1x18x18x128xbf16, #tpu.memory_space<vmem>>, vector<1x18x18x128xbf16>
    %1 = vector.shape_cast %0 : vector<1x18x18x128xbf16> to vector<18x18x128xbf16>
    %2 = vector.extract_strided_slice %1 {offsets = [0, 0, 0], sizes = [18, 16, 128], strides = [1, 1, 1]} : vector<18x18x128xbf16> to vector<18x16x128xbf16>
    %3 = vector.extract_strided_slice %1 {offsets = [0, 1, 0], sizes = [18, 16, 128], strides = [1, 1, 1]} : vector<18x18x128xbf16> to vector<18x16x128xbf16>
    %4 = vector.extract_strided_slice %1 {offsets = [0, 2, 0], sizes = [18, 16, 128], strides = [1, 1, 1]} : vector<18x18x128xbf16> to vector<18x16x128xbf16>
    %5 = tpu.concatenate %2, %3, %4 in 2 : vector<18x16x128xbf16>, vector<18x16x128xbf16>, vector<18x16x128xbf16> -> vector<18x16x384xbf16>
    %6 = vector.extract_strided_slice %5 {offsets = [0, 0, 0], sizes = [16, 16, 384], strides = [1, 1, 1]} : vector<18x16x384xbf16> to vector<16x16x384xbf16>
    %7 = vector.shape_cast %6 : vector<16x16x384xbf16> to vector<256x384xbf16>
    %c0_3 = arith.constant 0 : index
    %c0_4 = arith.constant 0 : index
    %c0_5 = arith.constant 0 : index
    %8 = vector.load %arg2[%c0_3, %c0_4, %c0_5] : memref<3x384x128xbf16, #tpu.memory_space<vmem>>, vector<1x384x128xbf16>
    %9 = vector.shape_cast %8 : vector<1x384x128xbf16> to vector<384x128xbf16>
    %cst = arith.constant dense<0.000000e+00> : vector<256x128xf32>
    %10 = tpu.matmul %7, %9, %cst {dimension_numbers = #tpu.dot_dimension_numbers<[1], [0], [0], [1], [0, 0, 1, 1], [], []>} : vector<256x384xbf16>, vector<384x128xbf16>, vector<256x128xf32> -> vector<256x128xf32>
    %11 = vector.extract_strided_slice %5 {offsets = [1, 0, 0], sizes = [16, 16, 384], strides = [1, 1, 1]} : vector<18x16x384xbf16> to vector<16x16x384xbf16>
    %12 = vector.shape_cast %11 : vector<16x16x384xbf16> to vector<256x384xbf16>
    %c1 = arith.constant 1 : index
    %c0_6 = arith.constant 0 : index
    %c0_7 = arith.constant 0 : index
    %13 = vector.load %arg2[%c1, %c0_6, %c0_7] : memref<3x384x128xbf16, #tpu.memory_space<vmem>>, vector<1x384x128xbf16>
    %14 = vector.shape_cast %13 : vector<1x384x128xbf16> to vector<384x128xbf16>
    %cst_8 = arith.constant dense<0.000000e+00> : vector<256x128xf32>
    %15 = tpu.matmul %12, %14, %cst_8 {dimension_numbers = #tpu.dot_dimension_numbers<[1], [0], [0], [1], [0, 0, 1, 1], [], []>} : vector<256x384xbf16>, vector<384x128xbf16>, vector<256x128xf32> -> vector<256x128xf32>
    %16 = arith.addf %10, %15 : vector<256x128xf32>
    %17 = vector.extract_strided_slice %5 {offsets = [2, 0, 0], sizes = [16, 16, 384], strides = [1, 1, 1]} : vector<18x16x384xbf16> to vector<16x16x384xbf16>
    %18 = vector.shape_cast %17 : vector<16x16x384xbf16> to vector<256x384xbf16>
    %c2 = arith.constant 2 : index
    %c0_9 = arith.constant 0 : index
    %c0_10 = arith.constant 0 : index
    %19 = vector.load %arg2[%c2, %c0_9, %c0_10] : memref<3x384x128xbf16, #tpu.memory_space<vmem>>, vector<1x384x128xbf16>
    %20 = vector.shape_cast %19 : vector<1x384x128xbf16> to vector<384x128xbf16>
    %cst_11 = arith.constant dense<0.000000e+00> : vector<256x128xf32>
    %21 = tpu.matmul %18, %20, %cst_11 {dimension_numbers = #tpu.dot_dimension_numbers<[1], [0], [0], [1], [0, 0, 1, 1], [], []>} : vector<256x384xbf16>, vector<384x128xbf16>, vector<256x128xf32> -> vector<256x128xf32>
    %22 = arith.addf %16, %21 : vector<256x128xf32>
    %c0_12 = arith.constant 0 : index
    %c0_13 = arith.constant 0 : index
    %23 = vector.load %arg3[%c0_12, %c0_13] : memref<1x128xf32, #tpu.memory_space<vmem>>, vector<1x128xf32>
    %24 = vector.broadcast %23 : vector<1x128xf32> to vector<256x128xf32>
    %25 = arith.addf %22, %24 : vector<256x128xf32>
    %cst_14 = arith.constant 0.000000e+00 : f32
    %26 = vector.broadcast %cst_14 : f32 to vector<256x128xf32>
    %27 = arith.maximumf %25, %26 : vector<256x128xf32>
    %cst_15 = arith.constant dense<0.000000e+00> : vector<128xf32>
    %28 = vector.multi_reduction <add>, %27, %cst_15 [0] : vector<256x128xf32> to vector<128xf32>
    %29 = vector.shape_cast %28 : vector<128xf32> to vector<1x128xf32>
    %cst_16 = arith.constant 2.560000e+02 : f32
    %30 = vector.broadcast %cst_16 : f32 to vector<1x128xf32>
    %31 = arith.divf %29, %30 : vector<1x128xf32>
    %c0_17 = arith.constant 0 : index
    %c0_18 = arith.constant 0 : index
    %32 = vector.load %arg4[%c0_17, %c0_18] : memref<128x128xf32, #tpu.memory_space<vmem>>, vector<128x128xf32>
    %cst_19 = arith.constant dense<0.000000e+00> : vector<1x128xf32>
    %33 = tpu.matmul %31, %32, %cst_19 {dimension_numbers = #tpu.dot_dimension_numbers<[1], [0], [0], [1], [0, 0, 1, 1], [], []>} : vector<1x128xf32>, vector<128x128xf32>, vector<1x128xf32> -> vector<1x128xf32>
    %c0_20 = arith.constant 0 : index
    %c0_21 = arith.constant 0 : index
    %34 = vector.load %arg5[%c0_20, %c0_21] : memref<1x128xf32, #tpu.memory_space<vmem>>, vector<1x128xf32>
    %35 = arith.addf %33, %34 : vector<1x128xf32>
    %36 = arith.negf %35 : vector<1x128xf32>
    %37 = math.exp %36 : vector<1x128xf32>
    %cst_22 = arith.constant 1.000000e+00 : f32
    %38 = vector.broadcast %cst_22 : f32 to vector<1x128xf32>
    %39 = arith.addf %38, %37 : vector<1x128xf32>
    %40 = arith.divf %38, %39 : vector<1x128xf32>
    %41 = vector.broadcast %40 : vector<1x128xf32> to vector<256x128xf32>
    %42 = arith.mulf %27, %41 : vector<256x128xf32>
    %43 = arith.truncf %42 : vector<256x128xf32> to vector<256x128xbf16>
    %c0_23 = arith.constant 0 : index
    %c0_24 = arith.constant 0 : index
    %c0_25 = arith.constant 0 : index
    %44 = vector.load %arg6[%c0_23, %c0_24, %c0_25] : memref<1x256x128xbf16, #tpu.memory_space<vmem>>, vector<1x256x128xbf16>
    %45 = vector.shape_cast %44 : vector<1x256x128xbf16> to vector<256x128xbf16>
    %46 = vector.shape_cast %43 : vector<256x128xbf16> to vector<1x256x128xbf16>
    tpu.vector_store %arg6[%c0_23, %c0_24, %c0_25], %46 {strides = array<i32>} : memref<1x256x128xbf16, #tpu.memory_space<vmem>>, vector<1x256x128xbf16>,
    return
  }
  func.func @transform_0(%arg0: i32) -> (i32, i32, i32, i32) {
    %c0_i32 = arith.constant 0 : i32
    %c0_i32_0 = arith.constant 0 : i32
    %c0_i32_1 = arith.constant 0 : i32
    %c0_i32_2 = arith.constant 0 : i32
    return %arg0, %c0_i32, %c0_i32_0, %c0_i32_1 : i32, i32, i32, i32
  }
  func.func @transform_1(%arg0: i32) -> (i32, i32, i32) {
    %c0_i32 = arith.constant 0 : i32
    %c0_i32_0 = arith.constant 0 : i32
    %c0_i32_1 = arith.constant 0 : i32
    %c0_i32_2 = arith.constant 0 : i32
    return %c0_i32, %c0_i32_0, %c0_i32_1 : i32, i32, i32
  }
  func.func @transform_2(%arg0: i32) -> (i32, i32) {
    %c0_i32 = arith.constant 0 : i32
    %c0_i32_0 = arith.constant 0 : i32
    %c0_i32_1 = arith.constant 0 : i32
    return %c0_i32, %c0_i32_0 : i32, i32
  }
  func.func @transform_3(%arg0: i32) -> (i32, i32) {
    %c0_i32 = arith.constant 0 : i32
    %c0_i32_0 = arith.constant 0 : i32
    %c0_i32_1 = arith.constant 0 : i32
    return %c0_i32, %c0_i32_0 : i32, i32
  }
  func.func @transform_4(%arg0: i32) -> (i32, i32) {
    %c0_i32 = arith.constant 0 : i32
    %c0_i32_0 = arith.constant 0 : i32
    %c0_i32_1 = arith.constant 0 : i32
    return %c0_i32, %c0_i32_0 : i32, i32
  }
  func.func @transform_5(%arg0: i32) -> (i32, i32, i32) {
    %c0_i32 = arith.constant 0 : i32
    %c0_i32_0 = arith.constant 0 : i32
    %c0_i32_1 = arith.constant 0 : i32
    return %arg0, %c0_i32, %c0_i32_0 : i32, i32, i32
  }
}

</mosaic_0001>

<bundles_post_ra>
// kernel: tpu_custom_call.1
= control target key start
LH: loop header
LB: loop body
LE: loop exit
PB: predicated region body
PF: predicated region fallthrough
CT: control target
= control target key end

     0   :  { %10 = vsyncpa [#allocation3], 0  ;;  %s4782_s0 = inlined_call_operand.vmem [shape: bf16[2,18,18,128], index: 0, kind: input, shape index: {}]   ;;  %s4783_s1 = inlined_call_operand.vmem [shape: bf16[3,384,128], index: 1, kind: input, shape index: {}]   ;;  %s4784_s2 = inlined_call_operand.vmem [shape: f32[1,128], index: 2, kind: input, shape index: {}]   ;;  %s4785_s3 = inlined_call_operand.vmem [shape: f32[128,128], index: 3, kind: input, shape index: {}]   ;;  %s4786_s4 = inlined_call_operand.vmem [shape: f32[1,128], index: 4, kind: input, shape index: {}]   ;;  %s4787_s5 = inlined_call_operand.hbm [shape: bf16[2,256,128], index: 5, kind: output, shape index: {}]  }
   0x1   :  { %12 = vsyncpa [#allocation3 + $0x1], 0  ;;  %s3342_s18 = smov 0   ;;  %s3344_s19 = smov 0  }
   0x2   :  { %s3346_s20 = smov 0   ;;  %s3348_s21 = smov 0  }
   0x3 LB: > { %s3363_s22 = sadd.s32 4294967295, %s3307_s21   ;;  %s2502_s23 = sadd.s32 4294967294, %s3307_s21   ;;  %s3307_s21 = sphi %s3348_s21, %s4928_s21   ;;  %s3303_s20 = sphi %s3346_s20, %s4927_s20   ;;  %s3299_s19 = sphi %s3344_s19, %s4926_s19   ;;  %s3295_s18 = sphi %s3342_s18, %s4925_s18  }
   0x4   : > { %s3367_s24 = sadd.s32 1, %s3307_s21   ;;  %s135_s25 = sadd.s32 1, %s3303_s20 }
   0x5   : > { %s132_s26 = ssub.s32 %s3307_s21, %s3367_s24  ;;  %p145_p0 = scmp.ne.s32.totalorder %s3303_s20, %s3299_s19 }
   0x6   : > { %p133_p1 = scmp.eq.s32.totalorder %s132_s26, 0  ;;  %p146_p2 = scmp.eq.s32.totalorder %s3363_s22, 1 }
   0x7   : > { %p151_p3 = scmp.ne.s32.totalorder %s3299_s19, %s3295_s18  ;;  %p152_p4 = scmp.eq.s32.totalorder %s2502_s23, 1 }
   0x8   : > { %s3378_s27 = scalar_select %p133_p1, %s3303_s20, %s135_s25  }
   0x9   : > { %p3380_p5 = por %p146_p2, %p145_p0  ;;  %p3384_p6 = por %p152_p4, %p151_p3 }
   0xa   : > { %p2505_p7 = scmp.ge.s32.totalorder %s3307_s21, 1  ;;  %p190_p8 = scmp.lt.s32.totalorder %s3307_s21, 3 }
   0xc   : > { %p191_p9 = pnand %p2505_p7, %p190_p8 }
   0xe   : > { %194 = sbr.rel (%p191_p9) target bundleno = 978 (0x3d2), region = 40 }
  0x13   : > { %v3019_v0 = vld [vmem:[%s4783_s1 + $0xf8] sm:$0xff]  ;;  %v3018_v1 = vld [vmem:[%s4783_s1 + $0xf0] sm:$0xff]  ;;  %v3017_v2 = vld [vmem:[%s4783_s1 + $0xe8] sm:$0xff]  ;;  %p218_p10 = scmp.lt.s32.totalorder %s3363_s22, 1  ;;  %vm439_vm0 = vsmask.f32 7424 }
  0x14   : > { %988 = vmatpush.bf16.msra.mxu0 %v3019_v0  ;;  %3156 = vmatpush.bf16.msra.mxu1 %v3019_v0  ;;  %v3016_v3 = vld [vmem:[%s4783_s1 + $0xe0] sm:$0xff]  ;;  %v3015_v4 = vld [vmem:[%s4783_s1 + $0xd8] sm:$0xff]  ;;  %v3014_v5 = vld [vmem:[%s4783_s1 + $0xd0] sm:$0xff]  ;;  %vm674_vm1 = vcmask 1046528   ;;  %s215_s6 = sand.u32 1, %s3299_s19   ;;  %s3060_s10 = sshll.u32 %s3363_s22, 7 }
  0x15   : > { %3157 = vmatpush.bf16.msra.mxu2 %v3019_v0  ;;  %3158 = vmatpush.bf16.msra.mxu3 %v3019_v0  ;;  %s219_s17 = scalar_select %p218_p10, %s3363_s22, 1  ;;  %v3013_v6 = vld [vmem:[%s4783_s1 + $0xc8] sm:$0xff]  ;;  %v3012_v7 = vld [vmem:[%s4783_s1 + $0xc0] sm:$0xff]  ;;  %v3003_v8 = vld [vmem:[%s4783_s1 + $0x78] sm:$0xff] }
  0x16   : > { %v3035_v9 = vld [vmem:[%s4783_s1 + $0x178] sm:$0xff]  ;;  %v3002_v14 = vld [vmem:[%s4783_s1 + $0x70] sm:$0xff]  ;;  %v3001_v18 = vld [vmem:[%s4783_s1 + $0x68] sm:$0xff]  ;;  %s2506_s7 = sshll.u32 %s215_s6, 7  ;;  %s2436_s12 = scalar_lea.hbm %s4787_s5, %s3060_s10 }
  0x17   : > { %s3180_s26 = smul.u32 216, %s219_s17  ;;  %v3027_v10 = vld [vmem:[%s4783_s1 + $0x138] sm:$0xff]  ;;  %v3034_v15 = vld [vmem:[%s4783_s1 + $0x170] sm:$0xff]  ;;  %v3033_v20 = vld [vmem:[%s4783_s1 + $0x168] sm:$0xff]  ;;  %s4702_s8 = scalar_lea.vmem [#allocation2], %s2506_s7 }
  0x18   : > { %989 = vmatpush.bf16.msra.mxu0 %v3018_v1  ;;  %3159 = vmatpush.bf16.msra.mxu1 %v3018_v1  ;;  %v3026_v16 = vld [vmem:[%s4783_s1 + $0x130] sm:$0xff]  ;;  %v2995_v19 = vld [vmem:[%s4783_s1 + $0x38] sm:$0xff]  ;;  %v3025_v21 = vld [vmem:[%s4783_s1 + $0x128] sm:$0xff]  ;;  %s2439_s13 = sshll.u32 %s2436_s12, 4  ;;  %s2425_s14 = scalar_lea.sflag [#allocation3], %s215_s6  ;;  %s2440_s13 = int_to_ptr.hbm [resolvable:$true] %s2439_s13 }
  0x19   : > { %3160 = vmatpush.bf16.msra.mxu2 %v3018_v1  ;;  %3161 = vmatpush.bf16.msra.mxu3 %v3018_v1  ;;  %s3419_s9 = scalar_lea.vmem %s4782_s0, %s3180_s26  ;;  %v2994_v22 = vld [vmem:[%s4783_s1 + $0x30] sm:$0xff]  ;;  %v3000_v23 = vld [vmem:[%s4783_s1 + $0x60] sm:$0xff]  ;;  %v3031_v26 = vld [vmem:[%s4783_s1 + $0x158] sm:$0xff]  ;;  %s3259_s15 = sshra.s32 %s2440_s13, 4  ;;  %s3260_s15 = int_to_ptr.hbm [resolvable:$true] %s3259_s15 }
  0x1a   : > { %v3431_v11 = vld [vmem:[%s3419_s9 + $0xc] sm:$0xff]  ;;  %v3437_v13 = vld [vmem:[%s3419_s9 + $0x78] sm:$0xff]  ;;  %v3032_v24 = vld [vmem:[%s4783_s1 + $0x160] sm:$0xff]  ;;  %s3261_s16 = scalar_lea.hbm %s3260_s15, 128  ;;  %s3265_s25 = scalar_lea.hbm %s4787_s5, 256 }
  0x1b   : > { %v3434_v12 = vld [vmem:[%s3419_s9 + $0x48] sm:$0xff]  ;;  %v3452_v17 = vld [vmem:[%s3419_s9 + $0xb4] sm:$0xff]  ;;  %v3024_v25 = vld [vmem:[%s4783_s1 + $0x120] sm:$0xff]  ;;  %v455_v58 = vshll.u32 %v3431_v11, 16  ;;  %v453_v63 = vshrl.u32 %v3431_v11, 16  ;;  %p3262_p11 = scmp.ne.s32.totalorder %s3260_s15, %s3261_s16  ;;  %p3266_p0 = scmp.lt.s32.totalorder %s3260_s15, %s4787_s5 }
  0x1c   : > { %990 = vmatpush.bf16.msra.mxu0 %v3017_v2  ;;  %3162 = vmatpush.bf16.msra.mxu1 %v3017_v2  ;;  %v3483_v27 = vld [vmem:[%s3419_s9 + $0x18] sm:$0xff]  ;;  %v3489_v29 = vld [vmem:[%s3419_s9 + $0x84] sm:$0xff]  ;;  %v3030_v33 = vld [vmem:[%s4783_s1 + $0x150] sm:$0xff]  ;;  %p3267_p1 = scmp.lt.s32.totalorder %s3265_s25, %s3261_s16 }
  0x1d   : > { %3163 = vmatpush.bf16.msra.mxu2 %v3017_v2  ;;  %3164 = vmatpush.bf16.msra.mxu3 %v3017_v2  ;;  %v3486_v28 = vld [vmem:[%s3419_s9 + $0x54] sm:$0xff]  ;;  %v2993_v31 = vld [vmem:[%s4783_s1 + $0x28] sm:$0xff]  ;;  %v2992_v35 = vld [vmem:[%s4783_s1 + $0x20] sm:$0xff]  ;;  %v457_v0 = vrot.slane %v455_v58, 1  ;;  %p3263_p12 = pnand %p3262_p11, %p3380_p5 }
  0x1e   : > { %v3023_v30 = vld [vmem:[%s4783_s1 + $0x118] sm:$0xff]  ;;  %v3022_v34 = vld [vmem:[%s4783_s1 + $0x110] sm:$0xff]  ;;  %v3513_v36 = vld [vmem:[%s3419_s9 + $0xc0] sm:$0xff]  ;;  %p3268_p2 = por %p3267_p1, %p3266_p0 }
  0x1f   : > { %v2999_v32 = vld [vmem:[%s4783_s1 + $0x58] sm:$0xff]  ;;  %v2998_v37 = vld [vmem:[%s4783_s1 + $0x50] sm:$0xff]  ;;  %v3029_v38 = vld [vmem:[%s4783_s1 + $0x148] sm:$0xff]  ;;  %v458_v2 = vor.u32 %v457_v0, %v453_v63  ;;  %p3264_p13 = pneg %p3263_p12 }
  0x20   : > { %991 = vmatpush.bf16.msra.mxu0 %v3016_v3  ;;  %3165 = vmatpush.bf16.msra.mxu1 %v3016_v3  ;;  %v3021_v39 = vld [vmem:[%s4783_s1 + $0x108] sm:$0xff]  ;;  %v2991_v40 = vld [vmem:[%s4783_s1 + $0x18] sm:$0xff]  ;;  %v3020_v41 = vld [vmem:[%s4783_s1 + $0x100] sm:$0xff] }
  0x21   : > { %3166 = vmatpush.bf16.msra.mxu2 %v3016_v3  ;;  %3167 = vmatpush.bf16.msra.mxu3 %v3016_v3  ;;  %v2990_v42 = vld [vmem:[%s4783_s1 + $0x10] sm:$0xff]  ;;  %v3535_v43 = vld [vmem:[%s3419_s9 + $0x24] sm:$0xff]  ;;  %v3573_v55 = vld [vmem:[%s3419_s9 + $0x9c] sm:$0xff]  ;;  %p3269_p3 = pnand %p3268_p2, %p3264_p13 }
  0x22   : > { %v3538_v44 = vld [vmem:[%s3419_s9 + $0x60] sm:$0xff]  ;;  %v3541_v45 = vld [vmem:[%s3419_s9 + $0x90] sm:$0xff]  ;;  %v2989_v46 = vld [vmem:[%s4783_s1 + $0x8] sm:$0xff] }
  0x23   : > { %v2997_v47 = vld [vmem:[%s4783_s1 + $0x48] sm:$0xff]  ;;  %v3028_v48 = vld [vmem:[%s4783_s1 + $0x140] sm:$0xff]  ;;  %v228_v52 = vld [vmem:[%s3419_s9 + $0x14] sm:$0x1] }
  0x24   : > { %992 = vmatpush.bf16.msra.mxu0 %v3015_v4  ;;  %3168 = vmatpush.bf16.msra.mxu1 %v3015_v4  ;;  %v2988_v49 = vld [vmem:[%s4783_s1] sm:$0xff]  ;;  %v3567_v53 = vld [vmem:[%s3419_s9 + $0x30] sm:$0xff]  ;;  %v404_v56 = vunpack.c.l.b16 %v228_v52  ;;  %v3043_v59 = vld [vmem:[%s4783_s1 + $0x1b8] sm:$0xff] }
  0x25   : > { %3169 = vmatpush.bf16.msra.mxu2 %v3015_v4  ;;  %3170 = vmatpush.bf16.msra.mxu3 %v3015_v4  ;;  %v2996_v50 = vld [vmem:[%s4783_s1 + $0x40] sm:$0xff]  ;;  %v3570_v54 = vld [vmem:[%s3419_s9 + $0x6c] sm:$0xff]  ;;  %v3051_v60 = vld [vmem:[%s4783_s1 + $0x1f8] sm:$0xff]  ;;  %v491_v0 = vshll.u32 %v3567_v53, 16 }
  0x26   : > { %v3562_v51 = vld [vmem:[%s3419_s9] sm:$0xff]  ;;  %v422_v57 = vpack.c.b16 %v404_v56, %v404_v56  ;;  %v3011_v61 = vld [vmem:[%s4783_s1 + $0xb8] sm:$0xff] }
  0x27   : > { %v3059_v62 = vld [vmem:[%s4783_s1 + $0x238] sm:$0xff]  ;;  %v231_v4 = vld [vmem:[%s3419_s9 + $0x20] sm:$0x1] }
  0x28   : > { %993 = vmatpush.bf16.msra.mxu0 %v3014_v5  ;;  %3171 = vmatpush.bf16.msra.mxu1 %v3014_v5  ;;  %v460_v1 = vshll.u32 %v422_v57, 16 }
  0x29   : > { %3172 = vmatpush.bf16.msra.mxu2 %v3014_v5  ;;  %3173 = vmatpush.bf16.msra.mxu3 %v3014_v5  ;;  %v225_v5 = vld [vmem:[%s3419_s9 + $0x8] sm:$0x1] }
  0x2a   : > { %v462_v3 = vrot.slane %v460_v1, 1  ;;  %v493_v1 = vrot.slane %v491_v0, 1 }
  0x2c   : > { %994 = vmatpush.bf16.msra.mxu0 %v3013_v6  ;;  %3174 = vmatpush.bf16.msra.mxu1 %v3013_v6 }
  0x2d   : > { %3175 = vmatpush.bf16.msra.mxu2 %v3013_v6  ;;  %3176 = vmatpush.bf16.msra.mxu3 %v3013_v6  ;;  %v3596_v6 = vld [vmem:[%s3419_s9 + $0x3c] sm:$0xff] }
  0x30   : > { %995 = vmatpush.bf16.msra.mxu0 %v3012_v7  ;;  %3177 = vmatpush.bf16.msra.mxu1 %v3012_v7 }
  0x31   : > { %3178 = vmatpush.bf16.msra.mxu2 %v3012_v7  ;;  %3179 = vmatpush.bf16.msra.mxu3 %v3012_v7  ;;  %v3599_v7 = vld [vmem:[%s3419_s9 + $0xa8] sm:$0xff] }
  0x33   : > { %996 = vmatmul.bf16.vlgmr.msra.gmra.mxu0 %v3431_v11  ;;  %1021 = vmatmul.bf16.vlgmr.msra.gmra.mxu1 %v3434_v12 }
  0x34   : > { %1488 = vmatpush.bf16.msrb.mxu0 %v3003_v8  ;;  %1077 = vmatpush.bf16.msrb.mxu1 %v3027_v10  ;;  %v463_v8 = vsel %vm439_vm0, %v458_v2, %v462_v3  ;;  %v403_v10 = vunpack.c.l.b16 %v225_v5  ;;  %v684_v5 = vrot.slane %v3535_v43, 1 }
  0x35   : > { %1166 = vmatpush.bf16.msrb.mxu2 %v3035_v9  ;;  %1066 = vmatmul.bf16.vlgmr.msra.gmra.mxu3 %v3452_v17  ;;  %v405_v9 = vunpack.c.l.b16 %v231_v4 }
  0x36   : > { %1041 = vmatmul.bf16.vlgmr.msra.gmra.mxu2 %v3437_v13  ;;  %1399 = vmatpush.bf16.msrb.mxu3 %v2995_v19  ;;  %v465_v19 = vshrl.u32 %v3483_v27, 16 }
  0x38   : > { %1489 = vmatpush.bf16.msrb.mxu0 %v3002_v14  ;;  %1078 = vmatpush.bf16.msrb.mxu1 %v3026_v16  ;;  %v467_v14 = vshll.u32 %v3483_v27, 16  ;;  %v3605_v16 = vpack.c.b16 %v403_v10, %v403_v10  ;;  %v240_v10 = vld [vmem:[%s3419_s9 + $0x44] sm:$0x1] }
  0x39   : > { %1167 = vmatpush.bf16.msrb.mxu2 %v3034_v15  ;;  %v423_v15 = vpack.c.b16 %v405_v9, %v405_v9 }
  0x3a   : > { %1400 = vmatpush.bf16.msrb.mxu3 %v2994_v22  ;;  %v441_v22 = vshrl.u32 %v3562_v51, 16 }
  0x3b   : > { %v682_v58 = vrot.slane %v423_v15, 1 }
  0x3c   : > { %1490 = vmatpush.bf16.msrb.mxu0 %v3001_v18  ;;  %1079 = vmatpush.bf16.msrb.mxu1 %v3025_v21  ;;  %v443_v18 = vshll.u32 %v3562_v51, 16  ;;  %v472_v21 = vshll.u32 %v423_v15, 16 }
  0x3d   : > { %1168 = vmatpush.bf16.msrb.mxu2 %v3033_v20  ;;  %v469_v20 = vrot.slane %v467_v14, 1 }
  0x3e   : > { %1401 = vmatpush.bf16.msrb.mxu3 %v2993_v31 }
  0x40   : > { %1491 = vmatpush.bf16.msrb.mxu0 %v3000_v23  ;;  %1080 = vmatpush.bf16.msrb.mxu1 %v3024_v25  ;;  %v445_v23 = vrot.slane %v443_v18, 1  ;;  %v470_v25 = vor.u32 %v469_v20, %v465_v19  ;;  %v503_v19 = vshll.u32 %v3596_v6, 16  ;;  %v3049_v20 = vld [vmem:[%s4783_s1 + $0x1e8] sm:$0xff] }
  0x41   : > { %1169 = vmatpush.bf16.msrb.mxu2 %v3032_v24  ;;  %v448_v24 = vshll.u32 %v3605_v16, 16 }
  0x42   : > { %1402 = vmatpush.bf16.msrb.mxu3 %v2992_v35 }
  0x43   : > { %1001 = vmatmul.bf16.gmra.mxu0 %v3483_v27  ;;  %1026 = vmatmul.bf16.gmra.mxu1 %v3486_v28  ;;  %v450_v31 = vrot.slane %v448_v24, 1  ;;  %v3009_v24 = vld [vmem:[%s4783_s1 + $0xa8] sm:$0xff] }
  0x44   : > { %1081 = vmatpush.bf16.msrb.mxu1 %v3023_v30  ;;  %1492 = vmatpush.bf16.msrb.mxu0 %v2999_v32  ;;  %v446_v30 = vor.u32 %v445_v23, %v441_v22  ;;  %v678_v32 = vrot.slane %v3431_v11, 1  ;;  %v505_v22 = vrot.slane %v503_v19, 1 }
  0x45   : > { %1170 = vmatpush.bf16.msrb.mxu2 %v3031_v26  ;;  %1071 = vmatmul.bf16.gmra.mxu3 %v3513_v36  ;;  %v474_v26 = vrot.slane %v472_v21, 1  ;;  %v501_v21 = vshrl.u32 %v3596_v6, 16 }
  0x46   : > { %1046 = vmatmul.bf16.gmra.mxu2 %v3489_v29  ;;  %1403 = vmatpush.bf16.msrb.mxu3 %v2991_v40 }
  0x47   : > { %v3615_v35 = vsel %vm439_vm0, %v470_v25, %v474_v26  ;;  %v3057_v25 = vld [vmem:[%s4783_s1 + $0x228] sm:$0xff]  ;;  %v506_v26 = vor.u32 %v505_v22, %v501_v21  ;;  %v3008_v22 = vld [vmem:[%s4783_s1 + $0xa0] sm:$0xff] }
  0x48   : > { %1082 = vmatpush.bf16.msrb.mxu1 %v3022_v34  ;;  %1493 = vmatpush.bf16.msrb.mxu0 %v2998_v37  ;;  %v234_v34 = vld [vmem:[%s3419_s9 + $0x2c] sm:$0x1]  ;;  %v451_v37 = vsel %vm439_vm0, %v446_v30, %v450_v31  ;;  %v687_v31 = vrot.slane %v3567_v53, 1 }
  0x49   : > { %1171 = vmatpush.bf16.msrb.mxu2 %v3030_v33  ;;  %v679_v33 = vrot.slane %v422_v57, 1  ;;  %v681_v57 = vrot.slane %v3483_v27, 1 }
  0x4a   : > { %1404 = vmatpush.bf16.msrb.mxu3 %v2990_v42  ;;  %v3050_v42 = vld [vmem:[%s4783_s1 + $0x1f0] sm:$0xff] }
  0x4c   : > { %1083 = vmatpush.bf16.msrb.mxu1 %v3021_v39  ;;  %1494 = vmatpush.bf16.msrb.mxu0 %v2997_v47  ;;  %v3619_v39 = vsel %vm674_vm1, %v678_v32, %v679_v33  ;;  %v3058_v47 = vld [vmem:[%s4783_s1 + $0x230] sm:$0xff] }
  0x4d   : > { %1172 = vmatpush.bf16.msrb.mxu2 %v3029_v38  ;;  %v406_v38 = vunpack.c.l.b16 %v234_v34  ;;  %v243_v33 = vld [vmem:[%s3419_s9 + $0x50] sm:$0x1] }
  0x4e   : > { %1405 = vmatpush.bf16.msrb.mxu3 %v2989_v46  ;;  %v3010_v46 = vld [vmem:[%s4783_s1 + $0xb0] sm:$0xff] }
  0x4f   : > { %v424_v40 = vpack.c.b16 %v406_v38, %v406_v38 }
  0x50   : > { %1084 = vmatpush.bf16.msrb.mxu1 %v3020_v41  ;;  %1495 = vmatpush.bf16.msrb.mxu0 %v2996_v50  ;;  %v3042_v41 = vld [vmem:[%s4783_s1 + $0x1b0] sm:$0xff] }
  0x51   : > { %1173 = vmatpush.bf16.msrb.mxu2 %v3028_v48  ;;  %v477_v48 = vshrl.u32 %v3535_v43, 16  ;;  %v484_v50 = vshll.u32 %v424_v40, 16  ;;  %v685_v9 = vrot.slane %v424_v40, 1  ;;  %v409_v40 = vunpack.c.l.b16 %v243_v33 }
  0x52   : > { %1406 = vmatpush.bf16.msrb.mxu3 %v2988_v49 }
  0x53   : > { %1006 = vmatmul.bf16.gmra.mxu0 %v3535_v43  ;;  %1031 = vmatmul.bf16.gmra.mxu1 %v3538_v44  ;;  %v486_v56 = vrot.slane %v484_v50, 1  ;;  %v3657_v15 = vsel %vm674_vm1, %v684_v5, %v685_v9  ;;  %v3040_v5 = vld [vmem:[%s4783_s1 + $0x1a0] sm:$0xff] }
  0x54   : > { %1577 = vmatpush.bf16.msra.mxu1 %v3011_v61  ;;  %2037 = vmatpush.bf16.msra.mxu0 %v3059_v62  ;;  %v3644_v62 = vsel %vm674_vm1, %v681_v57, %v682_v58  ;;  %v690_v57 = vrot.slane %v3596_v6, 1  ;;  %v3048_v9 = vld [vmem:[%s4783_s1 + $0x1e0] sm:$0xff] }
  0x55   : > { %1407 = vmatmul.bf16.vlgmr.msrb.gmra.mxu3 %v3562_v51  ;;  %1859 = vmatpush.bf16.msra.mxu2 %v3043_v59  ;;  %v237_v59 = vld [vmem:[%s3419_s9 + $0x38] sm:$0x1] }
  0x56   : > { %1051 = vmatmul.bf16.gmra.mxu2 %v3541_v45  ;;  %1948 = vmatpush.bf16.msra.mxu3 %v3051_v60  ;;  %v407_v61 = vunpack.c.l.b16 %v237_v59  ;;  %v246_v59 = vld [vmem:[%s3419_s9 + $0x5c] sm:$0x1] }
  0x58   : > { %1578 = vmatpush.bf16.msra.mxu1 %v3010_v46  ;;  %2038 = vmatpush.bf16.msra.mxu0 %v3058_v47  ;;  %v425_v63 = vpack.c.b16 %v407_v61, %v407_v61 }
  0x59   : > { %1860 = vmatpush.bf16.msra.mxu2 %v3042_v41  ;;  %v515_v41 = vshll.u32 %v3434_v12, 16 }
  0x5a   : > { %1949 = vmatpush.bf16.msra.mxu3 %v3050_v42  ;;  %v496_v2 = vshll.u32 %v425_v63, 16  ;;  %v688_v32 = vrot.slane %v425_v63, 1 }
  0x5c   : > { %v498_v4 = vrot.slane %v496_v2, 1  ;;  %1579 = vmatpush.bf16.msra.mxu1 %v3009_v24  ;;  %2039 = vmatpush.bf16.msra.mxu0 %v3057_v25  ;;  %v410_v2 = vunpack.c.l.b16 %v246_v59  ;;  %v537_v59 = vshrl.u32 %v3538_v44, 16 }
  0x5e   : > { %1950 = vmatpush.bf16.msra.mxu3 %v3049_v20 }
  0x60   : > { %1580 = vmatpush.bf16.msra.mxu1 %v3008_v22 }
  0x62   : > { %1951 = vmatpush.bf16.msra.mxu3 %v3048_v9 }
  0x63   : > { %1011 = vmatmul.bf16.gmra.mxu0 %v3567_v53  ;;  %1036 = vmatmul.bf16.gmra.mxu1 %v3570_v54 }
  0x65   : > { %1412 = vmatmul.bf16.gmra.mxu3 %v3431_v11  ;;  %v479_v11 = vshll.u32 %v3535_v43, 16 }
  0x66   : > { %1056 = vmatmul.bf16.gmra.mxu2 %v3573_v55 }
  0x67   : > { %v481_v49 = vrot.slane %v479_v11, 1  ;;  %v3687_v11 = vsel %vm674_vm1, %v687_v31, %v688_v32  ;;  %v249_v31 = vld [vmem:[%s3419_s9 + $0x68] sm:$0x1] }
  0x68   : > { %4833 = vst [vmem:[#allocation5_spill] sm:$0xff] %v3687_v11 }
  0x69   : > { %v482_v52 = vor.u32 %v481_v49, %v477_v48  ;;  %v513_v48 = vshrl.u32 %v3434_v12, 16  ;;  %v517_v49 = vrot.slane %v515_v41, 1 }
  0x6b   : > { %v3641_v60 = vsel %vm439_vm0, %v482_v52, %v486_v56  ;;  %v518_v52 = vor.u32 %v517_v49, %v513_v48  ;;  %v411_v49 = vunpack.c.l.b16 %v249_v31 }
  0x73   : > { %1016 = vmatmul.bf16.gmra.mxu0 %v3596_v6  ;;  %1085 = vmatmul.bf16.vlgmr.msrb.gmra.mxu1 %v463_v8 }
  0x75   : > { %1417 = vmatmul.bf16.gmra.mxu3 %v3483_v27  ;;  %v489_v27 = vshrl.u32 %v3567_v53, 16 }
  0x76   : > { %1061 = vmatmul.bf16.gmra.mxu2 %v3599_v7 }
  0x77   : > { %v494_v3 = vor.u32 %v493_v1, %v489_v27 }
  0x79   : > { %v3654_v14 = vsel %vm439_vm0, %v494_v3, %v498_v4  ;;  %v527_v4 = vshll.u32 %v3486_v28, 16 }
  0x7b   : > { %v529_v20 = vrot.slane %v527_v4, 1 }
  0x83   : > { %1090 = vmatmul.bf16.gmra.mxu1 %v3615_v35  ;;  %1496 = vmatmul.bf16.vlgmr.msrb.gmra.mxu0 %v451_v37 }
  0x85   : > { %1422 = vmatmul.bf16.gmra.mxu3 %v3535_v43  ;;  %v3041_v43 = vld [vmem:[%s4783_s1 + $0x1a8] sm:$0xff] }
  0x86   : > { %1174 = vmatmul.bf16.vlgmr.msrb.gmra.mxu2 %v3619_v39 }
  0x87   : > { %1861 = vmatpush.bf16.msra.mxu2 %v3041_v43  ;;  %v525_v43 = vshrl.u32 %v3486_v28, 16 }
  0x89   : > { %v530_v24 = vor.u32 %v529_v20, %v525_v43  ;;  %v696_v43 = vrot.slane %v3486_v28, 1 }
  0x8b   : > { %1862 = vmatpush.bf16.msra.mxu2 %v3040_v5 }
  0x93   : > { %1095 = vmatmul.bf16.gmra.mxu1 %v3641_v60  ;;  %1501 = vmatmul.bf16.gmra.mxu0 %v463_v8  ;;  %v408_v8 = vunpack.c.l.b16 %v240_v10 }
  0x95   : > { %1427 = vmatmul.bf16.gmra.mxu3 %v3567_v53  ;;  %v426_v18 = vpack.c.b16 %v408_v8, %v408_v8  ;;  %v427_v53 = vpack.c.b16 %v409_v40, %v409_v40 }
  0x96   : > { %1179 = vmatmul.bf16.gmra.mxu2 %v3644_v62 }
  0x97   : > { %v508_v23 = vshll.u32 %v426_v18, 16  ;;  %v520_v50 = vshll.u32 %v427_v53, 16  ;;  %v691_v58 = vrot.slane %v426_v18, 1 }
  0x99   : > { %v510_v30 = vrot.slane %v508_v23, 1  ;;  %v522_v56 = vrot.slane %v520_v50, 1  ;;  %v3715_v3 = vsel %vm674_vm1, %v690_v57, %v691_v58  ;;  %v3056_v23 = vld [vmem:[%s4783_s1 + $0x220] sm:$0xff] }
  0x9a   : > { %4835 = vst [vmem:[#allocation7_spill] sm:$0xff] %v3715_v3  ;;  %2040 = vmatpush.bf16.msra.mxu0 %v3056_v23 }
  0x9b   : > { %v3684_v38 = vsel %vm439_vm0, %v506_v26, %v510_v30  ;;  %v3712_v1 = vsel %vm439_vm0, %v518_v52, %v522_v56  ;;  %v693_v26 = vrot.slane %v3434_v12, 1  ;;  %v694_v30 = vrot.slane %v427_v53, 1 }
  0x9c   : > { %v539_v53 = vshll.u32 %v3538_v44, 16 }
  0x9d   : > { %v3757_v50 = vsel %vm674_vm1, %v693_v26, %v694_v30 }
  0x9e   : > { %4841 = vst [vmem:[#allocation13_spill] sm:$0xff] %v3757_v50 }
  0xa3   : > { %1100 = vmatmul.bf16.gmra.mxu1 %v3654_v14  ;;  %1506 = vmatmul.bf16.gmra.mxu0 %v3615_v35 }
  0xa5   : > { %1432 = vmatmul.bf16.gmra.mxu3 %v3596_v6  ;;  %v428_v6 = vpack.c.b16 %v410_v2, %v410_v2  ;;  %v541_v2 = vrot.slane %v539_v53, 1  ;;  %v3047_v53 = vld [vmem:[%s4783_s1 + $0x1d8] sm:$0xff] }
  0xa6   : > { %1184 = vmatmul.bf16.gmra.mxu2 %v3657_v15  ;;  %1952 = vmatpush.bf16.msra.mxu3 %v3047_v53 }
  0xa7   : > { %v532_v21 = vshll.u32 %v428_v6, 16  ;;  %v542_v5 = vor.u32 %v541_v2, %v537_v59  ;;  %v697_v20 = vrot.slane %v428_v6, 1  ;;  %v551_v6 = vshll.u32 %v3570_v54, 16 }
  0xa9   : > { %v534_v25 = vrot.slane %v532_v21, 1  ;;  %v252_v21 = vld [vmem:[%s3419_s9 + $0x74] sm:$0x1]  ;;  %v3787_v31 = vsel %vm674_vm1, %v696_v43, %v697_v20  ;;  %v553_v43 = vrot.slane %v551_v6, 1 }
  0xaa   : > { %v412_v30 = vunpack.c.l.b16 %v252_v21  ;;  %4846 = vst [vmem:[#allocation18_spill] sm:$0xff] %v3787_v31  ;;  %v3007_v21 = vld [vmem:[%s4783_s1 + $0x98] sm:$0xff] }
  0xab   : > { %v3754_v48 = vsel %vm439_vm0, %v530_v24, %v534_v25  ;;  %1581 = vmatpush.bf16.msra.mxu1 %v3007_v21 }
  0xac   : > { %4840 = vst [vmem:[#allocation12_spill] sm:$0xff] %v3754_v48 }
  0xb0   : > { %v3679_v34 = vpop.f32.mrf.mxu0  ;;  %v3681_v37 = vpop.f32.mrf.mxu1 }
  0xb3   : > { %1105 = vmatmul.bf16.gmra.mxu1 %v3684_v38  ;;  %1511 = vmatmul.bf16.gmra.mxu0 %v3641_v60 }
  0xb5   : > { %1437 = vmatmul.bf16.gmra.mxu3 %v3434_v12  ;;  %v429_v12 = vpack.c.b16 %v411_v49, %v411_v49  ;;  %v3039_v49 = vld [vmem:[%s4783_s1 + $0x198] sm:$0xff] }
  0xb6   : > { %1189 = vmatmul.bf16.gmra.mxu2 %v3687_v11 }
  0xb7   : > { %v544_v4 = vshll.u32 %v429_v12, 16  ;;  %1863 = vmatpush.bf16.msra.mxu2 %v3039_v49 }
  0xb8   : > { %v3695_v46 = vpop.f32.mrf.mxu0  ;;  %v3697_v47 = vpop.f32.mrf.mxu1 }
  0xb9   : > { %v3693_v42 = vpop.f32.mrf.mxu2  ;;  %v3705_v63 = vpop.f32.mrf.mxu3  ;;  %v546_v9 = vrot.slane %v544_v4, 1 }
  0xba   : > { %4834 = vst [vmem:[#allocation6_spill] sm:$0xff] %v3705_v63 }
  0xbb   : > { %v3784_v26 = vsel %vm439_vm0, %v542_v5, %v546_v9  ;;  %v549_v9 = vshrl.u32 %v3570_v54, 16 }
  0xbc   : > { %4845 = vst [vmem:[#allocation17_spill] sm:$0xff] %v3784_v26 }
  0xbd   : > { %v554_v49 = vor.u32 %v553_v43, %v549_v9 }
  0xc0   : > { %v3707_v0 = vpop.f32.mrf.mxu0  ;;  %v3709_v27 = vpop.f32.mrf.mxu1 }
  0xc1   : > { %v3703_v61 = vpop.f32.mrf.mxu2  ;;  %v3729_v8 = vpop.f32.mrf.mxu3 }
  0xc2   : > { %4837 = vst [vmem:[#allocation9_spill] sm:$0xff] %v3729_v8  ;;  %v255_v8 = vld [vmem:[%s3419_s9 + $0x80] sm:$0x1] }
  0xc3   : > { %1110 = vmatmul.bf16.gmra.mxu1 %v3712_v1  ;;  %1516 = vmatmul.bf16.gmra.mxu0 %v3654_v14  ;;  %v413_v9 = vunpack.c.l.b16 %v255_v8 }
  0xc5   : > { %1442 = vmatmul.bf16.gmra.mxu3 %v3486_v28  ;;  %v430_v28 = vpack.c.b16 %v412_v30, %v412_v30  ;;  %v3055_v30 = vld [vmem:[%s4783_s1 + $0x218] sm:$0xff] }
  0xc6   : > { %1194 = vmatmul.bf16.gmra.mxu2 %v3715_v3  ;;  %2041 = vmatpush.bf16.msra.mxu0 %v3055_v30 }
  0xc7   : > { %v556_v20 = vshll.u32 %v430_v28, 16 }
  0xc8   : > { %v3731_v18 = vpop.f32.mrf.mxu0  ;;  %v3733_v19 = vpop.f32.mrf.mxu1 }
  0xc9   : > { %v3727_v10 = vpop.f32.mrf.mxu2  ;;  %v3747_v33 = vpop.f32.mrf.mxu3  ;;  %v558_v53 = vrot.slane %v556_v20, 1 }
  0xca   : > { %4836 = vst [vmem:[#allocation8_spill] sm:$0xff] %v3727_v10 }
  0xcb   : > { %4839 = vst [vmem:[#allocation11_spill] sm:$0xff] %v3747_v33  ;;  %v700_v33 = vrot.slane %v429_v12, 1  ;;  %v563_v12 = vshll.u32 %v3437_v13, 16 }
  0xd0   : > { %v3749_v40 = vpop.f32.mrf.mxu0  ;;  %v3751_v41 = vpop.f32.mrf.mxu1 }
  0xd1   : > { %v3745_v32 = vpop.f32.mrf.mxu2  ;;  %v3765_v56 = vpop.f32.mrf.mxu3 }
  0xd2   : > { %4838 = vst [vmem:[#allocation10_spill] sm:$0xff] %v3745_v32 }
  0xd3   : > { %1115 = vmatmul.bf16.gmra.mxu1 %v3754_v48  ;;  %1521 = vmatmul.bf16.gmra.mxu0 %v3684_v38  ;;  %4843 = vst [vmem:[#allocation15_spill] sm:$0xff] %v3765_v56  ;;  %v699_v56 = vrot.slane %v3538_v44, 1 }
  0xd5   : > { %1447 = vmatmul.bf16.gmra.mxu3 %v3538_v44  ;;  %v3828_v20 = vsel %vm674_vm1, %v699_v56, %v700_v33  ;;  %v3833_v44 = vpack.c.b16 %v413_v9, %v413_v9  ;;  %v561_v33 = vshrl.u32 %v3437_v13, 16  ;;  %v565_v56 = vrot.slane %v563_v12, 1 }
  0xd6   : > { %1199 = vmatmul.bf16.gmra.mxu2 %v3757_v50  ;;  %v3824_v50 = vsel %vm439_vm0, %v554_v49, %v558_v53  ;;  %4849 = vst [vmem:[#allocation21_spill] sm:$0xff] %v3828_v20  ;;  %v702_v9 = vrot.slane %v3570_v54, 1 }
  0xd7   : > { %v566_v53 = vor.u32 %v565_v56, %v561_v33  ;;  %v573_v56 = vshrl.u32 %v3489_v29, 16 }
  0xd8   : > { %v3767_v57 = vpop.f32.mrf.mxu0  ;;  %v3769_v58 = vpop.f32.mrf.mxu1 }
  0xd9   : > { %v3763_v52 = vpop.f32.mrf.mxu2  ;;  %v3777_v23 = vpop.f32.mrf.mxu3 }
  0xda   : > { %4842 = vst [vmem:[#allocation14_spill] sm:$0xff] %v3763_v52 }
  0xe0   : > { %v3779_v24 = vpop.f32.mrf.mxu0  ;;  %v3781_v25 = vpop.f32.mrf.mxu1 }
  0xe1   : > { %v3775_v22 = vpop.f32.mrf.mxu2  ;;  %v3801_v2 = vpop.f32.mrf.mxu3 }
  0xe2   : > { %4844 = vst [vmem:[#allocation16_spill] sm:$0xff] %v3775_v22 }
  0xe3   : > { %1120 = vmatmul.bf16.gmra.mxu1 %v3784_v26  ;;  %1526 = vmatmul.bf16.gmra.mxu0 %v3712_v1 }
  0xe5   : > { %1452 = vmatmul.bf16.gmra.mxu3 %v3570_v54 }
  0xe6   : > { %1204 = vmatmul.bf16.gmra.mxu2 %v3787_v31 }
  0xe8   : > { %v3803_v4 = vpop.f32.mrf.mxu0  ;;  %v3805_v5 = vpop.f32.mrf.mxu1 }
  0xe9   : > { %v3799_v59 = vpop.f32.mrf.mxu2  ;;  %v3819_v63 = vpop.f32.mrf.mxu3 }
  0xea   : > { %4847 = vst [vmem:[#allocation19_spill] sm:$0xff] %v3799_v59 }
  0xf0   : > { %v3821_v31 = vpop.f32.mrf.mxu0  ;;  %v1086_v59 = vpop.f32.mrf.mxu1 }
  0xf1   : > { %v3817_v6 = vpop.f32.mrf.mxu2  ;;  %v1087_v43 = vadd.f32 %v1086_v59, %v3679_v34  ;;  %v3838_v30 = vpop.f32.mrf.mxu3  ;;  %v568_v59 = vshll.u32 %v3833_v44, 16 }
  0xf2   : > { %4848 = vst [vmem:[#allocation20_spill] sm:$0xff] %v3817_v6  ;;  %v703_v6 = vrot.slane %v430_v28, 1  ;;  %v575_v28 = vshll.u32 %v3489_v29, 16 }
  0xf3   : > { %1125 = vmatmul.bf16.gmra.mxu1 %v3824_v50  ;;  %1531 = vmatmul.bf16.gmra.mxu0 %v3754_v48 }
  0xf5   : > { %1457 = vmatmul.bf16.gmra.mxu3 %v3437_v13 }
  0xf6   : > { %1209 = vmatmul.bf16.gmra.mxu2 %v3828_v20  ;;  %v570_v20 = vrot.slane %v568_v59, 1  ;;  %v577_v59 = vrot.slane %v575_v28, 1 }
  0xf8   : > { %v3840_v8 = vpop.f32.mrf.mxu0  ;;  %v1088_v34 = vpop.f32.mrf.mxu1  ;;  %v3853_v12 = vsel %vm439_vm0, %v566_v53, %v570_v20  ;;  %v3038_v20 = vld [vmem:[%s4783_s1 + $0x190] sm:$0xff] }
  0xf9   : > { %v3836_v21 = vpop.f32.mrf.mxu2  ;;  %v1089_v49 = vadd.f32 %v1088_v34, %v3695_v46  ;;  %v3850_v52 = vpop.f32.mrf.mxu3  ;;  %v3857_v34 = vsel %vm674_vm1, %v702_v9, %v703_v6  ;;  %1864 = vmatpush.bf16.msra.mxu2 %v3038_v20  ;;  %v3006_v20 = vld [vmem:[%s4783_s1 + $0x90] sm:$0xff] }
  0xfa   : > { %4850 = vst [vmem:[#allocation22_spill] sm:$0xff] %v3836_v21  ;;  %v258_v21 = vld [vmem:[%s3419_s9 + $0x8c] sm:$0x1]  ;;  %1582 = vmatpush.bf16.msra.mxu1 %v3006_v20 }
  0xfb   : > { %v414_v48 = vunpack.c.l.b16 %v258_v21  ;;  %4852 = vst [vmem:[#allocation24_spill] sm:$0xff] %v3857_v34 }
  0xfd   : > { %v3862_v54 = vpack.c.b16 %v414_v48, %v414_v48 }
  0xff   : > { %v580_v53 = vshll.u32 %v3862_v54, 16 }
 0x100   : > { %v1091_v3 = vpop.f32.mrf.mxu1  ;;  %v1497_v32 = vpop.f32.mrf.mxu0 }
 0x101   : > { %v3848_v22 = vpop.f32.mrf.mxu2  ;;  %v1092_v46 = vadd.f32 %v1091_v3, %v3707_v0  ;;  %v3046_v0 = vld [vmem:[%s4783_s1 + $0x1d0] sm:$0xff]  ;;  %v3871_v6 = vpop.f32.mrf.mxu3 }
 0x102   : > { %4851 = vst [vmem:[#allocation23_spill] sm:$0xff] %v3848_v22  ;;  %1953 = vmatpush.bf16.msra.mxu3 %v3046_v0  ;;  %v578_v0 = vor.u32 %v577_v59, %v573_v56  ;;  %v705_v22 = vrot.slane %v3437_v13, 1 }
 0x103   : > { %1130 = vmatmul.bf16.gmra.mxu1 %v3853_v12  ;;  %1536 = vmatmul.bf16.gmra.mxu0 %v3784_v26 }
 0x105   : > { %1462 = vmatmul.bf16.gmra.mxu3 %v3489_v29 }
 0x106   : > { %1214 = vmatmul.bf16.gmra.mxu2 %v3857_v34 }
 0x108   : > { %v1093_v33 = vpop.f32.mrf.mxu1  ;;  %v1499_v48 = vpop.f32.mrf.mxu0 }
 0x109   : > { %v1175_v3 = vpop.f32.mrf.mxu2  ;;  %v1094_v9 = vadd.f32 %v1093_v33, %v3731_v18  ;;  %v706_v18 = vrot.slane %v3833_v44, 1  ;;  %v3889_v33 = vpop.f32.mrf.mxu3 }
 0x10a   : > { %v1176_v21 = vadd.f32 %v1175_v3, %v1087_v43  ;;  %v3054_v43 = vld [vmem:[%s4783_s1 + $0x210] sm:$0xff]  ;;  %v582_v3 = vrot.slane %v580_v53, 1 }
 0x10b   : > { %2042 = vmatpush.bf16.msra.mxu0 %v3054_v43 }
 0x10c   : > { %v1409_v34 = vadd.f32 %v3777_v23, %v1176_v21  ;;  %v261_v23 = vld [vmem:[%s3419_s9 + $0x98] sm:$0x1]  ;;  %v3892_v56 = vsel %vm439_vm0, %v578_v0, %v582_v3 }
 0x10d   : > { %v415_v59 = vunpack.c.l.b16 %v261_v23 }
 0x10e   : > { %v3884_v28 = vadd.f32 %v1497_v32, %v1409_v34  ;;  %v3896_v32 = vsel %vm674_vm1, %v705_v22, %v706_v18 }
 0x10f   : > { %4854 = vst [vmem:[#allocation26_spill] sm:$0xff] %v3896_v32  ;;  %v3902_v44 = vpack.c.b16 %v415_v59, %v415_v59  ;;  %v708_v59 = vrot.slane %v3489_v29, 1 }
 0x110   : > { %4853 = vst [vmem:[#allocation25_spill] sm:$0xff] %v3884_v28  ;;  %v1096_v10 = vpop.f32.mrf.mxu1  ;;  %v1502_v11 = vpop.f32.mrf.mxu0 }
 0x111   : > { %v1177_v21 = vpop.f32.mrf.mxu2  ;;  %v1097_v53 = vadd.f32 %v1096_v10, %v3749_v40  ;;  %v3907_v10 = vpop.f32.mrf.mxu3  ;;  %v592_v0 = vshll.u32 %v3902_v44, 16 }
 0x112   : > { %v1178_v26 = vadd.f32 %v1177_v21, %v1089_v49  ;;  %v587_v49 = vshll.u32 %v3541_v45, 16 }
 0x113   : > { %1135 = vmatmul.bf16.gmra.mxu1 %v3892_v56  ;;  %1541 = vmatmul.bf16.gmra.mxu0 %v3824_v50  ;;  %v594_v21 = vrot.slane %v592_v0, 1 }
 0x114   : > { %v1411_v13 = vadd.f32 %v3801_v2, %v1178_v26  ;;  %v585_v26 = vshrl.u32 %v3541_v45, 16  ;;  %v589_v2 = vrot.slane %v587_v49, 1 }
 0x115   : > { %1467 = vmatmul.bf16.gmra.mxu3 %v3541_v45 }
 0x116   : > { %1219 = vmatmul.bf16.gmra.mxu2 %v3896_v32  ;;  %v3905_v34 = vadd.f32 %v1499_v48, %v1411_v13  ;;  %v590_v23 = vor.u32 %v589_v2, %v585_v26  ;;  %v264_v13 = vld [vmem:[%s3419_s9 + $0xa4] sm:$0x1] }
 0x118   : > { %4855 = vst [vmem:[#allocation27_spill] sm:$0xff] %v3905_v34  ;;  %v1098_v22 = vpop.f32.mrf.mxu1  ;;  %v1504_v43 = vpop.f32.mrf.mxu0 }
 0x119   : > { %v1180_v20 = vpop.f32.mrf.mxu2  ;;  %v1099_v3 = vadd.f32 %v1098_v22, %v3767_v57  ;;  %v3919_v32 = vpop.f32.mrf.mxu3  ;;  %v3922_v57 = vsel %vm439_vm0, %v590_v23, %v594_v21  ;;  %v3037_v22 = vld [vmem:[%s4783_s1 + $0x188] sm:$0xff]  ;;  %v597_v23 = vshrl.u32 %v3573_v55, 16 }
 0x11a   : > { %v1181_v40 = vadd.f32 %v1180_v20, %v1092_v46  ;;  %v709_v46 = vrot.slane %v3862_v54, 1  ;;  %1865 = vmatpush.bf16.msra.mxu2 %v3037_v22 }
 0x11c   : > { %v1414_v18 = vadd.f32 %v3819_v63, %v1181_v40  ;;  %v416_v63 = vunpack.c.l.b16 %v264_v13 }
 0x11e   : > { %v3914_v48 = vadd.f32 %v1502_v11, %v1414_v18  ;;  %v3926_v11 = vsel %vm674_vm1, %v708_v59, %v709_v46  ;;  %v3932_v54 = vpack.c.b16 %v416_v63, %v416_v63 }
 0x120   : > { %v1101_v34 = vpop.f32.mrf.mxu1  ;;  %v1507_v28 = vpop.f32.mrf.mxu0  ;;  %v604_v59 = vshll.u32 %v3932_v54, 16 }
 0x121   : > { %v1182_v20 = vpop.f32.mrf.mxu2  ;;  %v1102_v40 = vadd.f32 %v1101_v34, %v3779_v24  ;;  %v3045_v24 = vld [vmem:[%s4783_s1 + $0x1c8] sm:$0xff]  ;;  %v3943_v26 = vpop.f32.mrf.mxu3 }
 0x122   : > { %v1183_v49 = vadd.f32 %v1182_v20, %v1094_v9  ;;  %v599_v9 = vshll.u32 %v3573_v55, 16  ;;  %1954 = vmatpush.bf16.msra.mxu3 %v3045_v24 }
 0x123   : > { %1140 = vmatmul.bf16.gmra.mxu1 %v3922_v57  ;;  %1546 = vmatmul.bf16.gmra.mxu0 %v3853_v12 }
 0x124   : > { %v1416_v29 = vadd.f32 %v3838_v30, %v1183_v49  ;;  %v601_v21 = vrot.slane %v599_v9, 1  ;;  %v606_v49 = vrot.slane %v604_v59, 1 }
 0x125   : > { %1472 = vmatmul.bf16.gmra.mxu3 %v3573_v55 }
 0x126   : > { %1224 = vmatmul.bf16.gmra.mxu2 %v3926_v11  ;;  %v3941_v34 = vadd.f32 %v1504_v43, %v1416_v29  ;;  %v3005_v43 = vld [vmem:[%s4783_s1 + $0x88] sm:$0xff]  ;;  %v602_v20 = vor.u32 %v601_v21, %v597_v23  ;;  %v711_v29 = vrot.slane %v3541_v45, 1 }
 0x127   : > { %1583 = vmatpush.bf16.msra.mxu1 %v3005_v43 }
 0x128   : > { %v1103_v0 = vpop.f32.mrf.mxu1  ;;  %v1509_v18 = vpop.f32.mrf.mxu0 }
 0x129   : > { %v1185_v30 = vpop.f32.mrf.mxu2  ;;  %v1104_v46 = vadd.f32 %v1103_v0, %v3803_v4  ;;  %v712_v4 = vrot.slane %v3902_v44, 1  ;;  %v3961_v22 = vpop.f32.mrf.mxu3  ;;  %v3964_v0 = vsel %vm439_vm0, %v602_v20, %v606_v49 }
 0x12a   : > { %v1186_v2 = vadd.f32 %v1185_v30, %v1097_v53  ;;  %v3053_v53 = vld [vmem:[%s4783_s1 + $0x208] sm:$0xff] }
 0x12b   : > { %2043 = vmatpush.bf16.msra.mxu0 %v3053_v53 }
 0x12c   : > { %v1419_v13 = vadd.f32 %v3850_v52, %v1186_v2  ;;  %v267_v52 = vld [vmem:[%s3419_s9 + $0xb0] sm:$0x1] }
 0x12d   : > { %v417_v23 = vunpack.c.l.b16 %v267_v52 }
 0x12e   : > { %v3956_v63 = vadd.f32 %v1507_v28, %v1419_v13  ;;  %v3968_v28 = vsel %vm674_vm1, %v711_v29, %v712_v4 }
 0x12f   : > { %4856 = vst [vmem:[#allocation28_spill] sm:$0xff] %v3968_v28  ;;  %v3974_v44 = vpack.c.b16 %v417_v23, %v417_v23  ;;  %v270_v23 = vld [vmem:[%s3419_s9 + $0xbc] sm:$0x1] }
 0x130   : > { %v1106_v30 = vpop.f32.mrf.mxu1  ;;  %v1512_v2 = vpop.f32.mrf.mxu0 }
 0x131   : > { %v1187_v9 = vpop.f32.mrf.mxu2  ;;  %v1107_v21 = vadd.f32 %v1106_v30, %v3821_v31  ;;  %v3979_v31 = vpop.f32.mrf.mxu3  ;;  %v616_v29 = vshll.u32 %v3974_v44, 16  ;;  %v714_v30 = vrot.slane %v3573_v55, 1 }
 0x132   : > { %v1188_v24 = vadd.f32 %v1187_v9, %v1099_v3  ;;  %v611_v3 = vshll.u32 %v3599_v7, 16 }
 0x133   : > { %1145 = vmatmul.bf16.gmra.mxu1 %v3964_v0  ;;  %1551 = vmatmul.bf16.gmra.mxu0 %v3892_v56 }
 0x134   : > { %v1421_v45 = vadd.f32 %v3871_v6, %v1188_v24  ;;  %v609_v6 = vshrl.u32 %v3599_v7, 16  ;;  %v613_v49 = vrot.slane %v611_v3, 1  ;;  %v618_v24 = vrot.slane %v616_v29, 1 }
 0x135   : > { %1477 = vmatmul.bf16.gmra.mxu3 %v3599_v7 }
 0x136   : > { %1229 = vmatmul.bf16.gmra.mxu2 %v3968_v28  ;;  %v3977_v59 = vadd.f32 %v1509_v18, %v1421_v45  ;;  %v614_v9 = vor.u32 %v613_v49, %v609_v6 }
 0x138   : > { %4857 = vst [vmem:[#allocation29_spill] sm:$0xff] %v3977_v59  ;;  %v1108_v53 = vpop.f32.mrf.mxu1  ;;  %v1514_v20 = vpop.f32.mrf.mxu0 }
 0x139   : > { %v1190_v13 = vpop.f32.mrf.mxu2  ;;  %v1109_v4 = vadd.f32 %v1108_v53, %v3840_v8  ;;  %v3994_v8 = vsel %vm439_vm0, %v614_v9, %v618_v24  ;;  %v3044_v53 = vld [vmem:[%s4783_s1 + $0x1c0] sm:$0xff]  ;;  %v621_v24 = vshrl.u32 %v3452_v17, 16 }
 0x13a   : > { %v1191_v43 = vadd.f32 %v1190_v13, %v1102_v40  ;;  %v715_v40 = vrot.slane %v3932_v54, 1  ;;  %v3991_v13 = vpop.f32.mrf.mxu3  ;;  %v623_v54 = vshll.u32 %v3452_v17, 16  ;;  %1955 = vmatpush.bf16.msra.mxu3 %v3044_v53 }
 0x13c   : > { %v1424_v52 = vadd.f32 %v3889_v33, %v1191_v43  ;;  %v418_v33 = vunpack.c.l.b16 %v270_v23  ;;  %v3997_v43 = vsel %vm674_vm1, %v714_v30, %v715_v40  ;;  %v625_v30 = vrot.slane %v623_v54, 1  ;;  %v273_v54 = vld [vmem:[%s3419_s9 + $0xc8] sm:$0x1] }
 0x13e   : > { %v3986_v18 = vadd.f32 %v1512_v2, %v1424_v52  ;;  %v4003_v55 = vpack.c.b16 %v418_v33, %v418_v33  ;;  %v4026_v33 = vld [vmem:[%s3419_s9 + $0xb4] sm:$0xff] }
 0x140   : > { %v1111_v28 = vpop.f32.mrf.mxu1  ;;  %v1517_v59 = vpop.f32.mrf.mxu0  ;;  %v628_v40 = vshll.u32 %v4003_v55, 16 }
 0x141   : > { %v1192_v45 = vpop.f32.mrf.mxu2 }
 0x142   : > { %v1193_v3 = vadd.f32 %v1192_v45, %v1104_v46  ;;  %v3036_v46 = vld [vmem:[%s4783_s1 + $0x180] sm:$0xff]  ;;  %v4014_v49 = vpop.f32.mrf.mxu3 }
 0x143   : > { %1150 = vmatmul.bf16.gmra.mxu1 %v3994_v8  ;;  %1556 = vmatmul.bf16.gmra.mxu0 %v3922_v57  ;;  %v3052_v45 = vld [vmem:[%s4783_s1 + $0x200] sm:$0xff] }
 0x144   : > { %v1426_v2 = vadd.f32 %v3907_v10, %v1193_v3  ;;  %1866 = vmatpush.bf16.msra.mxu2 %v3036_v46  ;;  %v626_v3 = vor.u32 %v625_v30, %v621_v24  ;;  %2044 = vmatpush.bf16.msra.mxu0 %v3052_v45 }
 0x145   : > { %1482 = vmatmul.bf16.gmra.mxu3 %v4026_v33 }
 0x146   : > { %1234 = vmatmul.bf16.gmra.mxu2 %v3997_v43  ;;  %v4012_v6 = vadd.f32 %v1514_v20, %v1426_v2  ;;  %v3004_v20 = vld [vmem:[%s4783_s1 + $0x80] sm:$0xff]  ;;  %v717_v2 = vrot.slane %v3599_v7, 1 }
 0x147   : > { %1584 = vmatpush.bf16.msra.mxu1 %v3004_v20 }
 0x148   : > { %v1113_v52 = vpop.f32.mrf.mxu1  ;;  %v1519_v9 = vpop.f32.mrf.mxu0 }
 0x149   : > { %v1195_v10 = vpop.f32.mrf.mxu2 }
 0x14a   : > { %v1196_v29 = vadd.f32 %v1195_v10, %v1107_v21  ;;  %v630_v21 = vrot.slane %v628_v40, 1  ;;  %v4034_v53 = vpop.f32.mrf.mxu3  ;;  %v419_v40 = vunpack.c.l.b16 %v273_v54 }
 0x14c   : > { %v1429_v23 = vadd.f32 %v3919_v32, %v1196_v29  ;;  %v718_v32 = vrot.slane %v3974_v44, 1  ;;  %v4037_v30 = vsel %vm439_vm0, %v626_v3, %v630_v21  ;;  %v437_v7 = vpack.c.b16 %v419_v40, %v419_v40 }
 0x14d   : > { %v635_v44 = vshll.u32 %v3513_v36, 16 }
 0x14e   : > { %v4029_v17 = vadd.f32 %v1517_v59, %v1429_v23  ;;  %v4040_v20 = vsel %vm674_vm1, %v717_v2, %v718_v32  ;;  %v1112_v23 = vadd.f32 %v1111_v28, %v3681_v37  ;;  %v720_v37 = vrot.slane %v4026_v33, 1 }
 0x14f   : > { %4859 = vst [vmem:[#allocation31_spill] sm:$0xff] %v4040_v20  ;;  %v637_v54 = vrot.slane %v635_v44, 1  ;;  %v721_v28 = vrot.slane %v4003_v55, 1 }
 0x150   : > { %4858 = vst [vmem:[#allocation30_spill] sm:$0xff] %v4029_v17  ;;  %v1116_v29 = vpop.f32.mrf.mxu1  ;;  %v1522_v24 = vpop.f32.mrf.mxu0 }
 0x151   : > { %v1197_v46 = vpop.f32.mrf.mxu2  ;;  %v1117_v55 = vadd.f32 %v1116_v29, %v3709_v27  ;;  %v724_v27 = vrot.slane %v437_v7, 1 }
 0x152   : > { %v1198_v10 = vadd.f32 %v1197_v46, %v1109_v4  ;;  %v4050_v3 = vpop.f32.mrf.mxu3  ;;  %v640_v46 = vshll.u32 %v437_v7, 16 }
 0x153   : > { %1155 = vmatmul.bf16.gmra.mxu1 %v4037_v30  ;;  %1561 = vmatmul.bf16.gmra.mxu0 %v3964_v0 }
 0x154   : > { %v1431_v59 = vadd.f32 %v3943_v26, %v1198_v10  ;;  %v633_v26 = vshrl.u32 %v3513_v36, 16  ;;  %v642_v40 = vrot.slane %v640_v46, 1 }
 0x155   : > { %1956 = vmatmul.bf16.vlgmr.msra.gmra.mxu3 %v3615_v35 }
 0x156   : > { %1239 = vmatmul.bf16.gmra.mxu2 %v4040_v20  ;;  %v4047_v4 = vadd.f32 %v1519_v9, %v1431_v59  ;;  %v638_v17 = vor.u32 %v637_v54, %v633_v26  ;;  %v1114_v59 = vadd.f32 %v1113_v52, %v3697_v47 }
 0x158   : > { %v1118_v2 = vpop.f32.mrf.mxu1  ;;  %v1524_v32 = vpop.f32.mrf.mxu0 }
 0x159   : > { %v1200_v45 = vpop.f32.mrf.mxu2  ;;  %v1119_v29 = vadd.f32 %v1118_v2, %v3733_v19 }
 0x15a   : > { %v1201_v21 = vadd.f32 %v1200_v45, %v1112_v23  ;;  %v4060_v45 = vpop.f32.mrf.mxu3 }
 0x15c   : > { %v1434_v10 = vadd.f32 %v3961_v22, %v1201_v21  ;;  %v4063_v22 = vsel %vm439_vm0, %v638_v17, %v642_v40  ;;  %v4066_v21 = vsel %vm674_vm1, %v720_v37, %v721_v28  ;;  %v4082_v37 = vld [vmem:[%s3419_s9 + $0xc0] sm:$0xff] }
 0x15e   : > { %v4055_v9 = vadd.f32 %v1522_v24, %v1434_v10  ;;  %v676_v10 = vrot.slane %v3605_v16, 1 }
 0x160   : > { %v1121_v44 = vpop.f32.mrf.mxu1  ;;  %v1527_v20 = vpop.f32.mrf.mxu0 }
 0x161   : > { %v1202_v23 = vpop.f32.mrf.mxu2  ;;  %v1122_v19 = vadd.f32 %v1121_v44, %v3751_v41  ;;  %v3232_v44 = vld [vmem:[%s3419_s9 + $0x18] sm:$0xff] }
 0x162   : > { %v1203_v36 = vadd.f32 %v1202_v23, %v1114_v59  ;;  %v1450_v24 = vpop.f32.mrf.mxu3 }
 0x163   : > { %1160 = vmatmul.bf16.gmra.mxu1 %v4063_v22  ;;  %1566 = vmatmul.bf16.gmra.mxu0 %v3994_v8 }
 0x164   : > { %v1436_v35 = vadd.f32 %v3979_v31, %v1203_v36  ;;  %v675_v31 = vrot.slane %v3562_v51, 1 }
 0x165   : > { %1961 = vmatmul.bf16.gmra.mxu3 %v3641_v60 }
 0x166   : > { %1244 = vmatmul.bf16.gmra.mxu2 %v4066_v21  ;;  %v4072_v47 = vadd.f32 %v1524_v32, %v1436_v35  ;;  %v723_v32 = vrot.slane %v4082_v37, 1  ;;  %v677_v51 = vsel %vm674_vm1, %v675_v31, %v676_v10 }
 0x168   : > { %v1123_v26 = vpop.f32.mrf.mxu1  ;;  %v1529_v54 = vpop.f32.mrf.mxu0  ;;  %v4088_v16 = vsel %vm674_vm1, %v723_v32, %v724_v27 }
 0x169   : > { %v1205_v52 = vpop.f32.mrf.mxu2 }
 0x16a   : > { %v1206_v17 = vadd.f32 %v1205_v52, %v1117_v55  ;;  %v1453_v59 = vpop.f32.mrf.mxu3 }
 0x16c   : > { %v1439_v46 = vadd.f32 %v3991_v13, %v1206_v17 }
 0x16e   : > { %v4079_v40 = vadd.f32 %v1527_v20, %v1439_v46  ;;  %v1124_v46 = vadd.f32 %v1123_v26, %v3769_v58 }
 0x170   : > { %v1126_v36 = vpop.f32.mrf.mxu1  ;;  %v1532_v13 = vpop.f32.mrf.mxu0 }
 0x171   : > { %v1207_v28 = vpop.f32.mrf.mxu2 }
 0x172   : > { %v1208_v23 = vadd.f32 %v1207_v28, %v1119_v29  ;;  %v1455_v2 = vpop.f32.mrf.mxu3 }
 0x173   : > { %1571 = vmatmul.bf16.gmra.mxu0 %v4037_v30  ;;  %1585 = vmatmul.bf16.vlgmr.msra.gmra.mxu1 %v677_v51 }
 0x174   : > { %v1441_v60 = vadd.f32 %v4014_v49, %v1208_v23 }
 0x175   : > { %1966 = vmatmul.bf16.gmra.mxu3 %v3654_v14  ;;  %v1127_v14 = vadd.f32 %v1126_v36, %v3781_v25  ;;  %v3233_v36 = vld [vmem:[%s3419_s9 + $0x24] sm:$0xff] }
 0x176   : > { %1249 = vmatmul.bf16.gmra.mxu2 %v4088_v16  ;;  %v4093_v20 = vadd.f32 %v1529_v54, %v1441_v60 }
 0x178   : > { %v1128_v55 = vpop.f32.mrf.mxu1  ;;  %v1534_v52 = vpop.f32.mrf.mxu0 }
 0x179   : > { %v1210_v7 = vpop.f32.mrf.mxu2 }
 0x17a   : > { %v1211_v35 = vadd.f32 %v1210_v7, %v1122_v19  ;;  %v1458_v10 = vpop.f32.mrf.mxu3 }
 0x17c   : > { %v1444_v17 = vadd.f32 %v4034_v53, %v1211_v35 }
 0x17e   : > { %v4098_v49 = vadd.f32 %v1532_v13, %v1444_v17 }
 0x180   : > { %v1131_v32 = vpop.f32.mrf.mxu1  ;;  %v1537_v27 = vpop.f32.mrf.mxu0 }
 0x181   : > { %v1212_v31 = vpop.f32.mrf.mxu2 }
 0x182   : > { %v1213_v54 = vadd.f32 %v1212_v31, %v1124_v46  ;;  %v1460_v28 = vpop.f32.mrf.mxu3 }
 0x183   : > { %1590 = vmatmul.bf16.gmra.mxu1 %v3619_v39  ;;  %2045 = vmatmul.bf16.vlgmr.msra.gmra.mxu0 %v3644_v62  ;;  %v1129_v39 = vadd.f32 %v1128_v55, %v3805_v5 }
 0x184   : > { %v1446_v41 = vadd.f32 %v4050_v3, %v1213_v54 }
 0x185   : > { %1971 = vmatmul.bf16.gmra.mxu3 %v3684_v38  ;;  %v1132_v38 = vadd.f32 %v1131_v32, %v3693_v42  ;;  %v4860_v42 = vld [vmem:[#allocation5_spill] sm:$0xff]  ;;  %v3234_v32 = vld [vmem:[%s3419_s9 + $0x30] sm:$0xff] }
 0x186   : > { %1867 = vmatmul.bf16.vlgmr.msra.gmra.mxu2 %v3232_v44  ;;  %v4105_v53 = vadd.f32 %v1534_v52, %v1446_v41 }
 0x188   : > { %v1133_v26 = vpop.f32.mrf.mxu1  ;;  %v1539_v23 = vpop.f32.mrf.mxu0 }
 0x189   : > { %v1215_v29 = vpop.f32.mrf.mxu2 }
 0x18a   : > { %v1216_v58 = vadd.f32 %v1215_v29, %v1127_v14  ;;  %v1463_v60 = vpop.f32.mrf.mxu3 }
 0x18c   : > { %v1449_v13 = vadd.f32 %v4060_v45, %v1216_v58 }
 0x18e   : > { %v4110_v3 = vadd.f32 %v1537_v27, %v1449_v13 }
 0x190   : > { %v1136_v7 = vpop.f32.mrf.mxu1  ;;  %v1542_v35 = vpop.f32.mrf.mxu0 }
 0x191   : > { %v1217_v51 = vpop.f32.mrf.mxu2 }
 0x192   : > { %v1218_v19 = vadd.f32 %v1217_v51, %v1129_v39  ;;  %v1465_v17 = vpop.f32.mrf.mxu3 }
 0x193   : > { %1595 = vmatmul.bf16.gmra.mxu1 %v3644_v62  ;;  %2050 = vmatmul.bf16.gmra.mxu0 %v3657_v15  ;;  %v1134_v62 = vadd.f32 %v1133_v26, %v3703_v61 }
 0x194   : > { %v1451_v25 = vadd.f32 %v1450_v24, %v1218_v19  ;;  %v4862_v19 = vld [vmem:[#allocation12_spill] sm:$0xff] }
 0x195   : > { %1976 = vmatmul.bf16.gmra.mxu3 %v3712_v1 }
 0x196   : > { %1872 = vmatmul.bf16.gmra.mxu2 %v3233_v36  ;;  %v4116_v52 = vadd.f32 %v1539_v23, %v1451_v25 }
 0x198   : > { %v1138_v55 = vpop.f32.mrf.mxu1  ;;  %v1544_v46 = vpop.f32.mrf.mxu0 }
 0x199   : > { %v1220_v45 = vpop.f32.mrf.mxu2 }
 0x19a   : > { %v1221_v5 = vadd.f32 %v1220_v45, %v1132_v38  ;;  %v1468_v27 = vpop.f32.mrf.mxu3 }
 0x19c   : > { %v1454_v31 = vadd.f32 %v1453_v59, %v1221_v5  ;;  %v4861_v59 = vld [vmem:[#allocation8_spill] sm:$0xff] }
 0x19d   : > { %v1137_v1 = vadd.f32 %v1136_v7, %v4861_v59  ;;  %v4864_v7 = vld [vmem:[#allocation7_spill] sm:$0xff] }
 0x19e   : > { %v4120_v24 = vadd.f32 %v1542_v35, %v1454_v31  ;;  %v3235_v31 = vld [vmem:[%s3419_s9 + $0x3c] sm:$0xff] }
 0x1a0   : > { %v1141_v44 = vpop.f32.mrf.mxu1  ;;  %v1547_v14 = vpop.f32.mrf.mxu0 }
 0x1a1   : > { %v1222_v54 = vpop.f32.mrf.mxu2 }
 0x1a2   : > { %v1223_v41 = vadd.f32 %v1222_v54, %v1134_v62  ;;  %v1470_v13 = vpop.f32.mrf.mxu3 }
 0x1a3   : > { %1600 = vmatmul.bf16.gmra.mxu1 %v3657_v15  ;;  %2055 = vmatmul.bf16.gmra.mxu0 %v4860_v42  ;;  %v4863_v15 = vld [vmem:[#allocation10_spill] sm:$0xff] }
 0x1a4   : > { %v1456_v29 = vadd.f32 %v1455_v2, %v1223_v41  ;;  %v1139_v35 = vadd.f32 %v1138_v55, %v4863_v15 }
 0x1a5   : > { %1981 = vmatmul.bf16.gmra.mxu3 %v4862_v19 }
 0x1a6   : > { %1877 = vmatmul.bf16.gmra.mxu2 %v3234_v32  ;;  %v4126_v58 = vadd.f32 %v1544_v46, %v1456_v29 }
 0x1a8   : > { %v1143_v26 = vpop.f32.mrf.mxu1  ;;  %v1549_v39 = vpop.f32.mrf.mxu0 }
 0x1a9   : > { %v1225_v23 = vpop.f32.mrf.mxu2 }
 0x1aa   : > { %v1226_v61 = vadd.f32 %v1225_v23, %v1137_v1  ;;  %v1473_v36 = vpop.f32.mrf.mxu3  ;;  %v4866_v1 = vld [vmem:[#allocation17_spill] sm:$0xff] }
 0x1ac   : > { %v1459_v51 = vadd.f32 %v1458_v10, %v1226_v61  ;;  %v4865_v10 = vld [vmem:[#allocation14_spill] sm:$0xff] }
 0x1ad   : > { %v1142_v54 = vadd.f32 %v1141_v44, %v4865_v10  ;;  %v4868_v44 = vld [vmem:[#allocation13_spill] sm:$0xff] }
 0x1ae   : > { %v4130_v2 = vadd.f32 %v1547_v14, %v1459_v51 }
 0x1b0   : > { %v1146_v45 = vpop.f32.mrf.mxu1  ;;  %v1552_v5 = vpop.f32.mrf.mxu0 }
 0x1b1   : > { %v1227_v25 = vpop.f32.mrf.mxu2 }
 0x1b2   : > { %v1228_v38 = vadd.f32 %v1227_v25, %v1139_v35  ;;  %v1475_v14 = vpop.f32.mrf.mxu3  ;;  %v3236_v25 = vld [vmem:[%s3419_s9 + $0x48] sm:$0xff] }
 0x1b3   : > { %1605 = vmatmul.bf16.gmra.mxu1 %v4860_v42  ;;  %2060 = vmatmul.bf16.gmra.mxu0 %v4864_v7  ;;  %v4867_v42 = vld [vmem:[#allocation16_spill] sm:$0xff] }
 0x1b4   : > { %v1461_v46 = vadd.f32 %v1460_v28, %v1228_v38  ;;  %v1144_v23 = vadd.f32 %v1143_v26, %v4867_v42 }
 0x1b5   : > { %1986 = vmatmul.bf16.gmra.mxu3 %v4866_v1 }
 0x1b6   : > { %1882 = vmatmul.bf16.gmra.mxu2 %v3235_v31  ;;  %v4136_v62 = vadd.f32 %v1549_v39, %v1461_v46 }
 0x1b8   : > { %v1148_v29 = vpop.f32.mrf.mxu1  ;;  %v1554_v32 = vpop.f32.mrf.mxu0 }
 0x1b9   : > { %v1230_v41 = vpop.f32.mrf.mxu2 }
 0x1ba   : > { %v1231_v55 = vadd.f32 %v1230_v41, %v1142_v54  ;;  %v1478_v51 = vpop.f32.mrf.mxu3 }
 0x1bc   : > { %v1464_v59 = vadd.f32 %v1463_v60, %v1231_v55  ;;  %v4869_v60 = vld [vmem:[#allocation19_spill] sm:$0xff] }
 0x1bd   : > { %v1147_v46 = vadd.f32 %v1146_v45, %v4869_v60  ;;  %v4871_v45 = vld [vmem:[#allocation18_spill] sm:$0xff] }
 0x1be   : > { %v4140_v28 = vadd.f32 %v1552_v5, %v1464_v59 }
 0x1c0   : > { %v1151_v39 = vpop.f32.mrf.mxu1  ;;  %v1557_v15 = vpop.f32.mrf.mxu0 }
 0x1c1   : > { %v1232_v61 = vpop.f32.mrf.mxu2 }
 0x1c2   : > { %v1233_v19 = vadd.f32 %v1232_v61, %v1144_v23  ;;  %v1480_v31 = vpop.f32.mrf.mxu3 }
 0x1c3   : > { %1610 = vmatmul.bf16.gmra.mxu1 %v4864_v7  ;;  %2065 = vmatmul.bf16.gmra.mxu0 %v4868_v44  ;;  %v4870_v7 = vld [vmem:[#allocation20_spill] sm:$0xff] }
 0x1c4   : > { %v1466_v35 = vadd.f32 %v1465_v17, %v1233_v19  ;;  %v1149_v55 = vadd.f32 %v1148_v29, %v4870_v7  ;;  %v3237_v19 = vld [vmem:[%s3419_s9 + $0x54] sm:$0xff] }
 0x1c5   : > { %1991 = vmatmul.bf16.gmra.mxu3 %v3824_v50 }
 0x1c6   : > { %1887 = vmatmul.bf16.gmra.mxu2 %v3236_v25  ;;  %v4146_v38 = vadd.f32 %v1554_v32, %v1466_v35 }
 0x1c8   : > { %v1153_v10 = vpop.f32.mrf.mxu1  ;;  %v1559_v54 = vpop.f32.mrf.mxu0 }
 0x1c9   : > { %v1235_v5 = vpop.f32.mrf.mxu2 }
 0x1ca   : > { %v1236_v26 = vadd.f32 %v1235_v5, %v1147_v46  ;;  %v1483_v1 = vpop.f32.mrf.mxu3 }
 0x1cc   : > { %v1469_v41 = vadd.f32 %v1468_v27, %v1236_v26  ;;  %v4872_v27 = vld [vmem:[#allocation22_spill] sm:$0xff] }
 0x1cd   : > { %v1152_v50 = vadd.f32 %v1151_v39, %v4872_v27  ;;  %v4874_v39 = vld [vmem:[#allocation21_spill] sm:$0xff] }
 0x1ce   : > { %v4150_v17 = vadd.f32 %v1557_v15, %v1469_v41 }
 0x1d0   : > { %v1156_v32 = vpop.f32.mrf.mxu1  ;;  %v1562_v23 = vpop.f32.mrf.mxu0 }
 0x1d1   : > { %v1237_v59 = vpop.f32.mrf.mxu2 }
 0x1d2   : > { %v1238_v42 = vadd.f32 %v1237_v59, %v1149_v55  ;;  %v1485_v25 = vpop.f32.mrf.mxu3 }
 0x1d3   : > { %1615 = vmatmul.bf16.gmra.mxu1 %v4868_v44  ;;  %2070 = vmatmul.bf16.gmra.mxu0 %v4871_v45  ;;  %v4873_v44 = vld [vmem:[#allocation23_spill] sm:$0xff] }
 0x1d4   : > { %v1471_v61 = vadd.f32 %v1470_v13, %v1238_v42  ;;  %v1154_v26 = vadd.f32 %v1153_v10, %v4873_v44 }
 0x1d5   : > { %1996 = vmatmul.bf16.gmra.mxu3 %v3853_v12 }
 0x1d6   : > { %1892 = vmatmul.bf16.gmra.mxu2 %v3237_v19  ;;  %v4156_v35 = vadd.f32 %v1559_v54, %v1471_v61  ;;  %v3238_v61 = vld [vmem:[%s3419_s9 + $0x60] sm:$0xff] }
 0x1d8   : > { %v1158_v60 = vpop.f32.mrf.mxu1  ;;  %v1564_v46 = vpop.f32.mrf.mxu0 }
 0x1d9   : > { %v1240_v15 = vpop.f32.mrf.mxu2 }
 0x1da   : > { %v1241_v29 = vadd.f32 %v1240_v15, %v1152_v50  ;;  %v1957_v7 = vpop.f32.mrf.mxu3 }
 0x1dc   : > { %v1474_v5 = vadd.f32 %v1473_v36, %v1241_v29  ;;  %v4875_v36 = vld [vmem:[#allocation6_spill] sm:$0xff] }
 0x1dd   : > { %v1157_v12 = vadd.f32 %v1156_v32, %v4875_v36  ;;  %v4878_v36 = vld [vmem:[#allocation24_spill] sm:$0xff] }
 0x1de   : > { %v4160_v13 = vadd.f32 %v1562_v23, %v1474_v5 }
 0x1e0   : > { %v1161_v54 = vpop.f32.mrf.mxu1  ;;  %v1567_v59 = vpop.f32.mrf.mxu0 }
 0x1e1   : > { %v1242_v41 = vpop.f32.mrf.mxu2 }
 0x1e2   : > { %v1243_v55 = vadd.f32 %v1242_v41, %v1154_v26  ;;  %v1959_v27 = vpop.f32.mrf.mxu3 }
 0x1e3   : > { %1620 = vmatmul.bf16.gmra.mxu1 %v4871_v45  ;;  %2075 = vmatmul.bf16.gmra.mxu0 %v4874_v39  ;;  %v4876_v45 = vld [vmem:[#allocation9_spill] sm:$0xff] }
 0x1e4   : > { %v1476_v42 = vadd.f32 %v1475_v14, %v1243_v55  ;;  %v1159_v5 = vadd.f32 %v1158_v60, %v4876_v45 }
 0x1e5   : > { %2001 = vmatmul.bf16.gmra.mxu3 %v3892_v56  ;;  %v4879_v56 = vld [vmem:[#allocation11_spill] sm:$0xff] }
 0x1e6   : > { %1897 = vmatmul.bf16.gmra.mxu2 %v3238_v61  ;;  %v4166_v19 = vadd.f32 %v1564_v46, %v1476_v42  ;;  %v4877_v42 = vld [vmem:[#allocation25_spill] sm:$0xff] }
 0x1e8   : > { %v1163_v10 = vpop.f32.mrf.mxu1  ;;  %v1569_v15 = vpop.f32.mrf.mxu0 }
 0x1e9   : > { %v1245_v23 = vpop.f32.mrf.mxu2 }
 0x1ea   : > { %v1246_v50 = vadd.f32 %v1245_v23, %v1157_v12  ;;  %v1962_v26 = vpop.f32.mrf.mxu3  ;;  %v3239_v12 = vld [vmem:[%s3419_s9 + $0x6c] sm:$0xff] }
 0x1ec   : > { %v1479_v29 = vadd.f32 %v1478_v51, %v1246_v50 }
 0x1ee   : > { %v4170_v14 = vadd.f32 %v1567_v59, %v1479_v29  ;;  %v1162_v59 = vadd.f32 %v1161_v54, %v4879_v56 }
 0x1f0   : > { %v1572_v46 = vpop.f32.mrf.mxu0  ;;  %v1586_v55 = vpop.f32.mrf.mxu1 }
 0x1f1   : > { %v1247_v44 = vpop.f32.mrf.mxu2  ;;  %v1587_v32 = vadd.f32 %v1586_v55, %v4877_v42 }
 0x1f2   : > { %v1248_v41 = vadd.f32 %v1247_v44, %v1159_v5  ;;  %v1964_v60 = vpop.f32.mrf.mxu3  ;;  %v4880_v5 = vld [vmem:[#allocation27_spill] sm:$0xff] }
 0x1f3   : > { %1625 = vmatmul.bf16.gmra.mxu1 %v4874_v39  ;;  %2080 = vmatmul.bf16.gmra.mxu0 %v4878_v36  ;;  %v4881_v39 = vld [vmem:[#allocation15_spill] sm:$0xff] }
 0x1f4   : > { %v1481_v61 = vadd.f32 %v1480_v31, %v1248_v41  ;;  %v1164_v41 = vadd.f32 %v1163_v10, %v4881_v39 }
 0x1f5   : > { %2006 = vmatmul.bf16.gmra.mxu3 %v3922_v57  ;;  %v3240_v57 = vld [vmem:[%s3419_s9 + $0x78] sm:$0xff] }
 0x1f6   : > { %1902 = vmatmul.bf16.gmra.mxu2 %v3239_v12  ;;  %v4177_v51 = vadd.f32 %v1569_v15, %v1481_v61 }
 0x1f8   : > { %v1574_v29 = vpop.f32.mrf.mxu0  ;;  %v1588_v45 = vpop.f32.mrf.mxu1 }
 0x1f9   : > { %v1250_v23 = vpop.f32.mrf.mxu2  ;;  %v1589_v44 = vadd.f32 %v1588_v45, %v4880_v5 }
 0x1fa   : > { %v1251_v50 = vadd.f32 %v1250_v23, %v1162_v59  ;;  %v1967_v15 = vpop.f32.mrf.mxu3  ;;  %v2286_v23 = vld [vmem:[%s4785_s3 + $0x78] sm:$0xff] }
 0x1fb   : > { %2288 = vmatpush.msrb.mxu1 %v2286_v23 }
 0x1fc   : > { %v1484_v55 = vadd.f32 %v1483_v1, %v1251_v50  ;;  %v4882_v1 = vld [vmem:[#allocation26_spill] sm:$0xff] }
 0x1fe   : > { %v4182_v31 = vadd.f32 %v1572_v46, %v1484_v55 }
 0x200   : > { %v1591_v12 = vpop.f32.mrf.mxu1  ;;  %v2046_v54 = vpop.f32.mrf.mxu0 }
 0x201   : > { %v1252_v42 = vpop.f32.mrf.mxu2  ;;  %v1592_v56 = vadd.f32 %v1591_v12, %v3914_v48 }
 0x202   : > { %v1253_v61 = vadd.f32 %v1252_v42, %v1164_v41  ;;  %v1969_v50 = vpop.f32.mrf.mxu3 }
 0x203   : > { %1630 = vmatmul.bf16.gmra.mxu1 %v4878_v36  ;;  %2085 = vmatmul.bf16.gmra.mxu0 %v4882_v1 }
 0x204   : > { %v1486_v59 = vadd.f32 %v1485_v25, %v1253_v61 }
 0x205   : > { %2011 = vmatmul.bf16.gmra.mxu3 %v3964_v0 }
 0x206   : > { %1907 = vmatmul.bf16.gmra.mxu2 %v3240_v57  ;;  %v4192_v10 = vadd.f32 %v1574_v29, %v1486_v59 }
 0x208   : > { %4883 = vst [vmem:[#allocation5_spill] sm:$0xff] %v4192_v10  ;;  %v1593_v5 = vpop.f32.mrf.mxu1  ;;  %v2048_v55 = vpop.f32.mrf.mxu0 }
 0x209   : > { %v1868_v46 = vpop.f32.mrf.mxu2  ;;  %v1594_v48 = vadd.f32 %v1593_v5, %v3941_v34 }
 0x20a   : > { %v1958_v45 = vadd.f32 %v1957_v7, %v1868_v46  ;;  %v1972_v41 = vpop.f32.mrf.mxu3  ;;  %v2285_v7 = vld [vmem:[%s4785_s3 + $0x70] sm:$0xff] }
 0x20b   : > { %2289 = vmatpush.msrb.mxu1 %v2285_v7 }
 0x20c   : > { %v2047_v25 = vadd.f32 %v2046_v54, %v1958_v45 }
 0x20e   : > { %v4195_v39 = vadd.f32 %v2047_v25, %v1587_v32  ;;  %v3241_v32 = vld [vmem:[%s3419_s9 + $0x84] sm:$0xff] }
 0x210   : > { %v1596_v61 = vpop.f32.mrf.mxu1  ;;  %v2051_v12 = vpop.f32.mrf.mxu0 }
 0x211   : > { %v1870_v36 = vpop.f32.mrf.mxu2  ;;  %v1597_v29 = vadd.f32 %v1596_v61, %v3956_v63  ;;  %v4884_v63 = vld [vmem:[#allocation29_spill] sm:$0xff] }
 0x212   : > { %v1960_v42 = vadd.f32 %v1959_v27, %v1870_v36  ;;  %v1974_v27 = vpop.f32.mrf.mxu3 }
 0x213   : > { %1635 = vmatmul.bf16.gmra.mxu1 %v4882_v1  ;;  %2090 = vmatmul.bf16.gmra.mxu0 %v3926_v11 }
 0x214   : > { %v2049_v59 = vadd.f32 %v2048_v55, %v1960_v42 }
 0x215   : > { %2016 = vmatmul.bf16.gmra.mxu3 %v3994_v8  ;;  %v3242_v8 = vld [vmem:[%s3419_s9 + $0x90] sm:$0xff] }
 0x216   : > { %v4204_v34 = vadd.f32 %v2049_v59, %v1589_v44  ;;  %1912 = vmatmul.bf16.gmra.mxu2 %v3241_v32 }
 0x218   : > { %v1598_v23 = vpop.f32.mrf.mxu1  ;;  %v2053_v57 = vpop.f32.mrf.mxu0 }
 0x219   : > { %v1873_v0 = vpop.f32.mrf.mxu2  ;;  %v1599_v46 = vadd.f32 %v1598_v23, %v4884_v63 }
 0x21a   : > { %v1963_v54 = vadd.f32 %v1962_v26, %v1873_v0  ;;  %v4211_v55 = vpop.f32.mrf.mxu3  ;;  %v2284_v26 = vld [vmem:[%s4785_s3 + $0x68] sm:$0xff] }
 0x21b   : > { %2290 = vmatpush.msrb.mxu1 %v2284_v26 }
 0x21c   : > { %v2052_v45 = vadd.f32 %v2051_v12, %v1963_v54  ;;  %v4885_v12 = vld [vmem:[#allocation28_spill] sm:$0xff] }
 0x21e   : > { %v4208_v5 = vadd.f32 %v2052_v45, %v1592_v56 }
 0x220   : > { %v1601_v25 = vpop.f32.mrf.mxu1  ;;  %v2056_v36 = vpop.f32.mrf.mxu0 }
 0x221   : > { %v1875_v1 = vpop.f32.mrf.mxu2  ;;  %v1602_v42 = vadd.f32 %v1601_v25, %v3986_v18 }
 0x222   : > { %v1965_v44 = vadd.f32 %v1964_v60, %v1875_v1  ;;  %v4222_v60 = vpop.f32.mrf.mxu3 }
 0x223   : > { %1640 = vmatmul.bf16.gmra.mxu1 %v3926_v11  ;;  %2095 = vmatmul.bf16.gmra.mxu0 %v4885_v12 }
 0x224   : > { %v2054_v61 = vadd.f32 %v2053_v57, %v1965_v44 }
 0x225   : > { %2021 = vmatmul.bf16.gmra.mxu3 %v4037_v30 }
 0x226   : > { %v4219_v56 = vadd.f32 %v2054_v61, %v1594_v48  ;;  %1917 = vmatmul.bf16.gmra.mxu2 %v3242_v8 }
 0x228   : > { %v1603_v32 = vpop.f32.mrf.mxu1  ;;  %v2058_v18 = vpop.f32.mrf.mxu0 }
 0x229   : > { %v1878_v59 = vpop.f32.mrf.mxu2  ;;  %v1604_v0 = vadd.f32 %v1603_v32, %v4012_v6 }
 0x22a   : > { %v1968_v7 = vadd.f32 %v1967_v15, %v1878_v59  ;;  %v4228_v48 = vpop.f32.mrf.mxu3  ;;  %v2283_v15 = vld [vmem:[%s4785_s3 + $0x60] sm:$0xff] }
 0x22b   : > { %2291 = vmatpush.msrb.mxu1 %v2283_v15 }
 0x22c   : > { %v2057_v54 = vadd.f32 %v2056_v36, %v1968_v7 }
 0x22e   : > { %v4225_v23 = vadd.f32 %v2057_v54, %v1597_v29  ;;  %v3243_v29 = vld [vmem:[%s3419_s9 + $0x9c] sm:$0xff] }
 0x22f   : > { %v2282_v54 = vld [vmem:[%s4785_s3 + $0x58] sm:$0xff] }
 0x230   : > { %v1606_v63 = vpop.f32.mrf.mxu1  ;;  %v2061_v45 = vpop.f32.mrf.mxu0  ;;  %2292 = vmatpush.msrb.mxu1 %v2282_v54 }
 0x231   : > { %v1880_v11 = vpop.f32.mrf.mxu2 }
 0x232   : > { %v1970_v57 = vadd.f32 %v1969_v50, %v1880_v11  ;;  %v4238_v44 = vpop.f32.mrf.mxu3  ;;  %v4254_v11 = vld [vmem:[%s3419_s9 + $0xcc] sm:$0xff] }
 0x233   : > { %1645 = vmatmul.bf16.gmra.mxu1 %v4885_v12  ;;  %2100 = vmatmul.bf16.gmra.mxu0 %v3997_v43  ;;  %v645_v15 = vshrl.u32 %v4254_v11, 16 }
 0x234   : > { %v2059_v1 = vadd.f32 %v2058_v18, %v1970_v57 }
 0x235   : > { %2026 = vmatmul.bf16.gmra.mxu3 %v4063_v22 }
 0x236   : > { %v4235_v6 = vadd.f32 %v2059_v1, %v1599_v46  ;;  %1922 = vmatmul.bf16.gmra.mxu2 %v3243_v29 }
 0x238   : > { %v1608_v25 = vpop.f32.mrf.mxu1  ;;  %v2063_v36 = vpop.f32.mrf.mxu0 }
 0x239   : > { %v1883_v30 = vpop.f32.mrf.mxu2  ;;  %v1609_v61 = vadd.f32 %v1608_v25, %v4047_v4  ;;  %v276_v4 = vld [vmem:[%s3419_s9 + $0xd4] sm:$0x1] }
 0x23a   : > { %v1973_v50 = vadd.f32 %v1972_v41, %v1883_v30  ;;  %v4244_v12 = vpop.f32.mrf.mxu3  ;;  %v420_v22 = vunpack.c.l.b16 %v276_v4 }
 0x23c   : > { %v2062_v26 = vadd.f32 %v2061_v45, %v1973_v50  ;;  %v4259_v45 = vpack.c.b16 %v420_v22, %v420_v22 }
 0x23e   : > { %v4241_v8 = vadd.f32 %v2062_v26, %v1602_v42  ;;  %v4886_v42 = vld [vmem:[#allocation31_spill] sm:$0xff] }
 0x240   : > { %v1611_v7 = vpop.f32.mrf.mxu1  ;;  %v2066_v32 = vpop.f32.mrf.mxu0 }
 0x241   : > { %v1885_v46 = vpop.f32.mrf.mxu2  ;;  %v1612_v18 = vadd.f32 %v1611_v7, %v4055_v9  ;;  %v647_v9 = vshll.u32 %v4254_v11, 16 }
 0x242   : > { %v1975_v59 = vadd.f32 %v1974_v27, %v1885_v46  ;;  %v3244_v27 = vld [vmem:[%s3419_s9 + $0xa8] sm:$0xff]  ;;  %s2437_s9 = sshll.u32 %s4702_s8, 4  ;;  %s2438_s9 = int_to_ptr.vmem [resolvable:$true] %s2437_s9 }
 0x243   : > { %1650 = vmatmul.bf16.gmra.mxu1 %v3997_v43  ;;  %2105 = vmatmul.bf16.gmra.mxu0 %v4886_v42  ;;  %v649_v29 = vrot.slane %v647_v9, 1  ;;  %v652_v43 = vshll.u32 %v4259_v45, 16 }
 0x244   : > { %v2064_v41 = vadd.f32 %v2063_v36, %v1975_v59  ;;  %v1989_v36 = vpop.f32.mrf.mxu3  ;;  %v4887_v59 = vld [vmem:[#allocation30_spill] sm:$0xff] }
 0x245   : > { %v650_v26 = vor.u32 %v649_v29, %v645_v15  ;;  %v654_v46 = vrot.slane %v652_v43, 1  ;;  %v1607_v7 = vadd.f32 %v1606_v63, %v4887_v59 }
 0x246   : > { %v4256_v57 = vadd.f32 %v2064_v41, %v1604_v0  ;;  %1927 = vmatmul.bf16.gmra.mxu2 %v3244_v27 }
 0x247   : > { %v655_v54 = vsel %vm439_vm0, %v650_v26, %v654_v46 }
 0x248   : > { %v1613_v50 = vpop.f32.mrf.mxu1  ;;  %v2068_v25 = vpop.f32.mrf.mxu0  ;;  %2031 = vmatmul.bf16.gmra.mxu3 %v655_v54 }
 0x249   : > { %v1888_v1 = vpop.f32.mrf.mxu2  ;;  %v1614_v0 = vadd.f32 %v1613_v50, %v4072_v47  ;;  %v2281_v47 = vld [vmem:[%s4785_s3 + $0x50] sm:$0xff] }
 0x24a   : > { %v1978_v30 = vadd.f32 %v4211_v55, %v1888_v1  ;;  %2293 = vmatpush.msrb.mxu1 %v2281_v47 }
 0x24c   : > { %v2067_v41 = vadd.f32 %v2066_v32, %v1978_v30  ;;  %v1992_v63 = vpop.f32.mrf.mxu3 }
 0x24e   : > { %v4268_v4 = vadd.f32 %v2067_v41, %v1607_v7 }
 0x250   : > { %v1616_v9 = vpop.f32.mrf.mxu1  ;;  %v2071_v55 = vpop.f32.mrf.mxu0 }
 0x251   : > { %v1890_v22 = vpop.f32.mrf.mxu2  ;;  %v1617_v1 = vadd.f32 %v1616_v9, %v4079_v40 }
 0x252   : > { %v1980_v27 = vadd.f32 %v4222_v60, %v1890_v22 }
 0x253   : > { %1655 = vmatmul.bf16.gmra.mxu1 %v4886_v42  ;;  %2110 = vmatmul.bf16.gmra.mxu0 %v4066_v21 }
 0x254   : > { %v2069_v10 = vadd.f32 %v2068_v25, %v1980_v27  ;;  %v1994_v25 = vpop.f32.mrf.mxu3 }
 0x256   : > { %v4277_v32 = vadd.f32 %v2069_v10, %v1609_v61  ;;  %1932 = vmatmul.bf16.gmra.mxu2 %v4026_v33 }
 0x258   : > { %v1618_v29 = vpop.f32.mrf.mxu1  ;;  %v2073_v40 = vpop.f32.mrf.mxu0 }
 0x259   : > { %v1893_v60 = vpop.f32.mrf.mxu2  ;;  %v1619_v43 = vadd.f32 %v1618_v29, %v4093_v20 }
 0x25a   : > { %v1983_v15 = vadd.f32 %v4228_v48, %v1893_v60  ;;  %v2280_v48 = vld [vmem:[%s4785_s3 + $0x48] sm:$0xff] }
 0x25b   : > { %2294 = vmatpush.msrb.mxu1 %v2280_v48 }
 0x25c   : > { %v2072_v30 = vadd.f32 %v2071_v55, %v1983_v15 }
 0x25e   : > { %v4282_v50 = vadd.f32 %v2072_v30, %v1612_v18 }
 0x260   : > { %v1621_v46 = vpop.f32.mrf.mxu1  ;;  %v2076_v10 = vpop.f32.mrf.mxu0 }
 0x261   : > { %v1895_v42 = vpop.f32.mrf.mxu2  ;;  %v1622_v61 = vadd.f32 %v1621_v46, %v4098_v49 }
 0x262   : > { %v1985_v26 = vadd.f32 %v4238_v44, %v1895_v42  ;;  %v1997_v44 = vpop.f32.mrf.mxu3 }
 0x263   : > { %1660 = vmatmul.bf16.gmra.mxu1 %v4066_v21  ;;  %2115 = vmatmul.bf16.gmra.mxu0 %v4088_v16  ;;  %v726_v21 = vrot.slane %v4254_v11, 1  ;;  %v727_v16 = vrot.slane %v4259_v45, 1 }
 0x264   : > { %v2074_v33 = vadd.f32 %v2073_v40, %v1985_v26 }
 0x265   : > { %v728_v55 = vsel %vm674_vm1, %v726_v21, %v727_v16 }
 0x266   : > { %v4291_v20 = vadd.f32 %v2074_v33, %v1614_v0  ;;  %1937 = vmatmul.bf16.gmra.mxu2 %v4082_v37 }
 0x268   : > { %v1623_v7 = vpop.f32.mrf.mxu1  ;;  %v2078_v49 = vpop.f32.mrf.mxu0 }
 0x269   : > { %v1898_v18 = vpop.f32.mrf.mxu2  ;;  %v1624_v41 = vadd.f32 %v1623_v7, %v4105_v53  ;;  %v2279_v53 = vld [vmem:[%s4785_s3 + $0x40] sm:$0xff] }
 0x26a   : > { %v1988_v59 = vadd.f32 %v4244_v12, %v1898_v18  ;;  %v1999_v12 = vpop.f32.mrf.mxu3  ;;  %2295 = vmatpush.msrb.mxu1 %v2279_v53 }
 0x26c   : > { %v2077_v54 = vadd.f32 %v2076_v10, %v1988_v59 }
 0x26e   : > { %v4296_v22 = vadd.f32 %v2077_v54, %v1617_v1 }
 0x270   : > { %v1626_v9 = vpop.f32.mrf.mxu1  ;;  %v2081_v37 = vpop.f32.mrf.mxu0 }
 0x271   : > { %v1900_v0 = vpop.f32.mrf.mxu2  ;;  %v1627_v47 = vadd.f32 %v1626_v9, %v4110_v3 }
 0x272   : > { %v1990_v27 = vadd.f32 %v1989_v36, %v1900_v0  ;;  %v2002_v3 = vpop.f32.mrf.mxu3 }
 0x273   : > { %2120 = vmatmul.bf16.gmra.mxu0 %v728_v55 }
 0x274   : > { %v2079_v60 = vadd.f32 %v2078_v49, %v1990_v27 }
 0x276   : > { %v4305_v1 = vadd.f32 %v2079_v60, %v1619_v43  ;;  %1942 = vmatmul.bf16.gmra.mxu2 %v4254_v11  ;;  %v2278_v11 = vld [vmem:[%s4785_s3 + $0x38] sm:$0xff] }
 0x277   : > { %2296 = vmatpush.msrb.mxu1 %v2278_v11 }
 0x278   : > { %v1628_v15 = vpop.f32.mrf.mxu1  ;;  %v2083_v29 = vpop.f32.mrf.mxu0 }
 0x279   : > { %v1903_v45 = vpop.f32.mrf.mxu2  ;;  %v1629_v40 = vadd.f32 %v1628_v15, %v4116_v52 }
 0x27a   : > { %v1993_v36 = vadd.f32 %v1992_v63, %v1903_v45  ;;  %v2004_v18 = vpop.f32.mrf.mxu3 }
 0x27c   : > { %v2082_v30 = vadd.f32 %v2081_v37, %v1993_v36 }
 0x27e   : > { %v4309_v42 = vadd.f32 %v2082_v30, %v1622_v61  ;;  %v2276_v30 = vld [vmem:[%s4785_s3 + $0x28] sm:$0xff] }
 0x280   : > { %v1631_v10 = vpop.f32.mrf.mxu1  ;;  %v2086_v33 = vpop.f32.mrf.mxu0 }
 0x281   : > { %v1905_v26 = vpop.f32.mrf.mxu2  ;;  %v1632_v48 = vadd.f32 %v1631_v10, %v4120_v24 }
 0x282   : > { %v1995_v46 = vadd.f32 %v1994_v25, %v1905_v26  ;;  %v2007_v24 = vpop.f32.mrf.mxu3 }
 0x284   : > { %v2084_v43 = vadd.f32 %v2083_v29, %v1995_v46 }
 0x286   : > { %v4315_v63 = vadd.f32 %v2084_v43, %v1624_v41  ;;  %v2277_v41 = vld [vmem:[%s4785_s3 + $0x30] sm:$0xff] }
 0x287   : > { %2297 = vmatpush.msrb.mxu1 %v2277_v41 }
 0x288   : > { %v1633_v7 = vpop.f32.mrf.mxu1  ;;  %v2088_v61 = vpop.f32.mrf.mxu0 }
 0x289   : > { %v1908_v52 = vpop.f32.mrf.mxu2  ;;  %v1634_v49 = vadd.f32 %v1633_v7, %v4126_v58  ;;  %2298 = vmatpush.msrb.mxu1 %v2276_v30  ;;  %v2275_v7 = vld [vmem:[%s4785_s3 + $0x20] sm:$0xff] }
 0x28a   : > { %v1998_v59 = vadd.f32 %v1997_v44, %v1908_v52  ;;  %v4326_v53 = vpop.f32.mrf.mxu3 }
 0x28b   : > { %2299 = vmatpush.msrb.mxu1 %v2275_v7 }
 0x28c   : > { %v2087_v25 = vadd.f32 %v2086_v33, %v1998_v59 }
 0x28e   : > { %v4318_v54 = vadd.f32 %v2087_v25, %v1627_v47 }
 0x290   : > { %v1636_v0 = vpop.f32.mrf.mxu1  ;;  %v2091_v27 = vpop.f32.mrf.mxu0 }
 0x291   : > { %v1910_v21 = vpop.f32.mrf.mxu2  ;;  %v1637_v9 = vadd.f32 %v1636_v0, %v4130_v2  ;;  %v4371_v0 = vld [vmem:[%s4784_s2] ss:$0 sm:$0xff] }
 0x292   : > { %v2000_v16 = vadd.f32 %v1999_v12, %v1910_v21  ;;  %v4382_v41 = vadd.f32 %v4371_v0, %v4204_v34 }
 0x294   : > { %v2089_v37 = vadd.f32 %v2088_v61, %v2000_v16 }
 0x296   : > { %v4324_v44 = vadd.f32 %v2089_v37, %v1629_v40 }
 0x298   : > { %v2093_v60 = vpop.f32.mrf.mxu0  ;;  %v4328_v45 = vpop.f32.mrf.mxu1 }
 0x299   : > { %v1913_v55 = vpop.f32.mrf.mxu2 }
 0x29a   : > { %v2003_v58 = vadd.f32 %v2002_v3, %v1913_v55  ;;  %v4337_v3 = vpop.f32.mrf.mxu3  ;;  %v4386_v55 = vadd.f32 %v4371_v0, %v4195_v39  ;;  %v4405_v39 = vadd.f32 %v4371_v0, %v4225_v23 }
 0x29c   : > { %v2092_v47 = vadd.f32 %v2091_v27, %v2003_v58  ;;  %v4390_v58 = vadd.f32 %v4371_v0, %v4208_v5  ;;  %v4809_v34 = vmax.f32 %v4386_v55, 0.0  ;;  %4889 = vst [vmem:[#allocation12_spill] sm:$0xff] %v4405_v39  ;;  %v4813_v23 = vmax.f32 %v4405_v39, 0.0 }
 0x29d   : > { %v4453_v39 = vadd.f32 %v4371_v0, %v4277_v32 }
 0x29e   : > { %v4330_v12 = vadd.f32 %v2092_v47, %v1632_v48  ;;  %v4808_v47 = vmax.f32 %v4382_v41, 0.0 }
 0x29f   : > { %4893 = vst [vmem:[#allocation17_spill] sm:$0xff] %v4453_v39  ;;  %v4823_v32 = vmax.f32 %v4453_v39, 0.0 }
 0x2a0   : > { %v2096_v15 = vpop.f32.mrf.mxu0  ;;  %v4339_v26 = vpop.f32.mrf.mxu1  ;;  %v2226_v5 = vadd.f32 %v4808_v47, %v4809_v34  ;;  %v4434_v47 = vadd.f32 %v4371_v0, %v4256_v57 }
 0x2a1   : > { %v1915_v36 = vpop.f32.mrf.mxu2 }
 0x2a2   : > { %v2005_v2 = vadd.f32 %v2004_v18, %v1915_v36  ;;  %v4345_v11 = vpop.f32.mrf.mxu3  ;;  %v4397_v36 = vadd.f32 %v4371_v0, %v4219_v56  ;;  %v4414_v56 = vadd.f32 %v4371_v0, %v4235_v6  ;;  %4892 = vst [vmem:[#allocation14_spill] sm:$0xff] %v4434_v47 }
 0x2a4   : > { %v2094_v29 = vadd.f32 %v2093_v60, %v2005_v2  ;;  %4888 = vst [vmem:[#allocation8_spill] sm:$0xff] %v4397_v36  ;;  %v4815_v6 = vmax.f32 %v4414_v56, 0.0 }
 0x2a5   : > { %4890 = vst [vmem:[#allocation10_spill] sm:$0xff] %v4414_v56  ;;  %v4480_v56 = vadd.f32 %v4371_v0, %v4296_v22 }
 0x2a6   : > { %v4335_v40 = vadd.f32 %v2094_v29, %v1634_v49  ;;  %v4811_v29 = vmax.f32 %v4397_v36, 0.0 }
 0x2a7   : > { %4896 = vst [vmem:[#allocation19_spill] sm:$0xff] %v4480_v56 }
 0x2a8   : > { %v4341_v33 = vpop.f32.mrf.mxu0  ;;  %v4347_v18 = vpop.f32.mrf.mxu1 }
 0x2a9   : > { %v1918_v46 = vpop.f32.mrf.mxu2 }
 0x2aa   : > { %v2008_v10 = vadd.f32 %v2007_v24, %v1918_v46  ;;  %v4360_v25 = vpop.f32.mrf.mxu3 }
 0x2ac   : > { %v2097_v48 = vadd.f32 %v2096_v15, %v2008_v10  ;;  %v4810_v15 = vmax.f32 %v4390_v58, 0.0 }
 0x2ae   : > { %v4343_v43 = vadd.f32 %v2097_v48, %v1637_v9  ;;  %v2274_v9 = vld [vmem:[%s4785_s3 + $0x18] sm:$0xff]  ;;  %v2227_v10 = vadd.f32 %v2226_v5, %v4810_v15  ;;  %v4425_v48 = vadd.f32 %v4371_v0, %v4241_v8  ;;  %v4443_v8 = vadd.f32 %v4371_v0, %v4268_v4 }
 0x2af   : > { %2300 = vmatpush.msrb.mxu1 %v2274_v9 }
 0x2b0   : > { %v4351_v59 = vpop.f32.mrf.mxu0  ;;  %v4362_v21 = vpop.f32.mrf.mxu1  ;;  %4891 = vst [vmem:[#allocation7_spill] sm:$0xff] %v4425_v48  ;;  %v2228_v9 = vadd.f32 %v2227_v10, %v4811_v29  ;;  %v4817_v15 = vmax.f32 %v4425_v48, 0.0  ;;  %v2273_v10 = vld [vmem:[%s4785_s3 + $0x10] sm:$0xff]  ;;  %v4819_v29 = vmax.f32 %v4434_v47, 0.0  ;;  %v4821_v4 = vmax.f32 %v4443_v8, 0.0 }
 0x2b1   : > { %v4349_v52 = vpop.f32.mrf.mxu2  ;;  %2301 = vmatpush.msrb.mxu1 %v2273_v10  ;;  %v4471_v48 = vadd.f32 %v4371_v0, %v4291_v20  ;;  %v4487_v20 = vadd.f32 %v4371_v0, %v4305_v1 }
 0x2b2   : > { %v4373_v27 = vpop.f32.mrf.mxu3  ;;  %v2229_v5 = vadd.f32 %v2228_v9, %v4813_v23  ;;  %v4460_v23 = vadd.f32 %v4371_v0, %v4282_v50 }
 0x2b3   : > { %4895 = vst [vmem:[#allocation13_spill] sm:$0xff] %v4471_v48 }
 0x2b4   : > { %v2230_v57 = vadd.f32 %v2229_v5, %v4815_v6  ;;  %4894 = vst [vmem:[#allocation16_spill] sm:$0xff] %v4460_v23 }
 0x2b6   : > { %v2231_v9 = vadd.f32 %v2230_v57, %v4817_v15  ;;  %v4824_v15 = vmax.f32 %v4460_v23, 0.0 }
 0x2b8   : > { %v4358_v49 = vpop.f32.mrf.mxu0  ;;  %v4378_v37 = vpop.f32.mrf.mxu1  ;;  %v2232_v6 = vadd.f32 %v2231_v9, %v4819_v29  ;;  %v4826_v29 = vmax.f32 %v4471_v48, 0.0 }
 0x2b9   : > { %v4356_v61 = vpop.f32.mrf.mxu2 }
 0x2ba   : > { %v4416_v30 = vpop.f32.mrf.mxu3  ;;  %v2233_v50 = vadd.f32 %v2232_v6, %v4821_v4  ;;  %v4827_v6 = vmax.f32 %v4480_v56, 0.0  ;;  %v4494_v4 = vadd.f32 %v4371_v0, %v4309_v42 }
 0x2bc   : > { %v2234_v9 = vadd.f32 %v2233_v50, %v4823_v32  ;;  %v4501_v32 = vadd.f32 %v4371_v0, %v4315_v63  ;;  %v2272_v63 = vld [vmem:[%s4785_s3 + $0x8] sm:$0xff]  ;;  %v4898_v56 = vmax.f32 %v4494_v4, 0.0 }
 0x2bd   : > { %2302 = vmatpush.msrb.mxu1 %v2272_v63 }
 0x2be   : > { %v2235_v47 = vadd.f32 %v2234_v9, %v4824_v15  ;;  %v2010_v9 = vadd.f32 %v4326_v53, %v4349_v52  ;;  %v4897_v53 = vmax.f32 %v4487_v20, 0.0 }
 0x2c0   : > { %v4366_v16 = vpop.f32.mrf.mxu0  ;;  %v4418_v46 = vpop.f32.mrf.mxu1  ;;  %v2236_v39 = vadd.f32 %v2235_v47, %v4826_v29  ;;  %v4512_v47 = vadd.f32 %v4371_v0, %v4318_v54  ;;  %v2013_v29 = vadd.f32 %v4337_v3, %v4356_v61  ;;  %v2099_v54 = vadd.f32 %v4341_v33, %v2010_v9 }
 0x2c1   : > { %v4364_v24 = vpop.f32.mrf.mxu2  ;;  %v4534_v61 = vadd.f32 %v4371_v0, %v4330_v12  ;;  %v1642_v12 = vadd.f32 %v4339_v26, %v4140_v28 }
 0x2c2   : > { %v4462_v36 = vpop.f32.mrf.mxu3  ;;  %v2237_v42 = vadd.f32 %v2236_v39, %v4827_v6  ;;  %v2209_v39 = vmax.f32 %v4501_v32, 0.0  ;;  %v4524_v6 = vadd.f32 %v4371_v0, %v4324_v44  ;;  %v2015_v23 = vadd.f32 %v4345_v11, %v4364_v24 }
 0x2c3   : > { %v2210_v3 = vmax.f32 %v4512_v47, 0.0  ;;  %v2102_v44 = vadd.f32 %v4351_v59, %v2013_v29  ;;  %v4558_v29 = vadd.f32 %v4371_v0, %v4343_v43  ;;  %v1647_v43 = vadd.f32 %v4362_v21, %v4150_v17 }
 0x2c4   : > { %v2238_v52 = vadd.f32 %v2237_v42, %v4897_v53  ;;  %v1639_v42 = vadd.f32 %v4328_v45, %v4136_v62  ;;  %v2211_v24 = vmax.f32 %v4524_v6, 0.0  ;;  %v2104_v62 = vadd.f32 %v4358_v49, %v2015_v23 }
 0x2c5   : > { %v2148_v28 = vadd.f32 %v2102_v44, %v1642_v12 }
 0x2c6   : > { %v2239_v48 = vadd.f32 %v2238_v52, %v4898_v56  ;;  %v4546_v56 = vadd.f32 %v4371_v0, %v4335_v40  ;;  %v2147_v63 = vadd.f32 %v2099_v54, %v1639_v42  ;;  %v1644_v40 = vadd.f32 %v4347_v18, %v4146_v38 }
 0x2c7   : > { %v2214_v54 = vmax.f32 %v4558_v29, 0.0  ;;  %v4578_v42 = vadd.f32 %v4371_v0, %v2148_v28 }
 0x2c8   : > { %v4399_v2 = vpop.f32.mrf.mxu0  ;;  %v4464_v10 = vpop.f32.mrf.mxu1  ;;  %v2240_v11 = vadd.f32 %v2239_v48, %v2209_v39  ;;  %v2213_v23 = vmax.f32 %v4546_v56, 0.0  ;;  %v2149_v53 = vadd.f32 %v2104_v62, %v1644_v40 }
 0x2c9   : > { %v4392_v60 = vpop.f32.mrf.mxu2 }
 0x2ca   : > { %v2027_v1 = vpop.f32.mrf.mxu3  ;;  %v2018_v33 = vadd.f32 %v4360_v25, %v4392_v60  ;;  %v2241_v59 = vadd.f32 %v2240_v11, %v2210_v3  ;;  %v2212_v25 = vmax.f32 %v4534_v61, 0.0  ;;  %v1652_v11 = vadd.f32 %v4418_v46, %v4160_v13  ;;  %v2271_v13 = vld [vmem:[%s4785_s3] sm:$0xff] }
 0x2cb   : > { %2303 = vmatpush.msrb.mxu1 %v2271_v13 }
 0x2cc   : > { %v2107_v26 = vadd.f32 %v4366_v16, %v2018_v33 }
 0x2d0   : > { %v4436_v34 = vpop.f32.mrf.mxu0  ;;  %v4505_v15 = vpop.f32.mrf.mxu1 }
 0x2d1   : > { %v4427_v7 = vpop.f32.mrf.mxu2 }
 0x2d2   : > { %v2020_v45 = vadd.f32 %v4373_v27, %v4427_v7  ;;  %v2029_v60 = vpop.f32.mrf.mxu3  ;;  %v2242_v27 = vadd.f32 %v2241_v59, %v2211_v24  ;;  %v4568_v7 = vadd.f32 %v4371_v0, %v2147_v63 }
 0x2d4   : > { %v2109_v38 = vadd.f32 %v4399_v2, %v2020_v45  ;;  %v2243_v16 = vadd.f32 %v2242_v27, %v2212_v25  ;;  %v2215_v33 = vmax.f32 %v4568_v7, 0.0 }
 0x2d6   : > { %v2244_v2 = vadd.f32 %v2243_v16, %v2213_v23 }
 0x2d8   : > { %v4473_v57 = vpop.f32.mrf.mxu0  ;;  %v1658_v49 = vpop.f32.mrf.mxu1 }
 0x2d9   : > { %v1933_v5 = vpop.f32.mrf.mxu2 }
 0x2da   : > { %v2023_v48 = vadd.f32 %v4416_v30, %v1933_v5  ;;  %v1649_v30 = vadd.f32 %v4378_v37, %v4156_v35  ;;  %v2150_v5 = vadd.f32 %v2107_v26, %v1647_v43  ;;  %v2245_v37 = vadd.f32 %v2244_v2, %v2214_v54  ;;  %v2032_v45 = vpop.f32.mrf.mxu3 }
 0x2db   : > { %v1659_v43 = vadd.f32 %v1658_v49, %v4177_v51 }
 0x2dc   : > { %v2112_v17 = vadd.f32 %v4436_v34, %v2023_v48  ;;  %v2216_v34 = vmax.f32 %v4578_v42, 0.0  ;;  %v2246_v46 = vadd.f32 %v2245_v37, %v2215_v33 }
 0x2de   : > { %v2152_v63 = vadd.f32 %v2112_v17, %v1652_v11  ;;  %v2247_v40 = vadd.f32 %v2246_v46, %v2216_v34  ;;  %v3309_v17 = vmov 256.0   ;;  %v4899_v46 = vld [vmem:[#allocation5_spill] sm:$0xff] }
 0x2df   : > { %3224 = vrcp.f32 %v3309_v17 }
 0x2e0   : > { %v2116_v50 = vpop.f32.mrf.mxu0  ;;  %v4615_v48 = vadd.f32 %v4371_v0, %v2152_v63 }
 0x2e1   : > { %v1935_v22 = vpop.f32.mrf.mxu2 }
 0x2e2   : > { %v2025_v52 = vadd.f32 %v4462_v36, %v1935_v22  ;;  %v4587_v36 = vadd.f32 %v4371_v0, %v2149_v53  ;;  %v2151_v22 = vadd.f32 %v2109_v38, %v1649_v30 }
 0x2e4   : > { %v2114_v12 = vadd.f32 %v4473_v57, %v2025_v52  ;;  %v2217_v57 = vmax.f32 %v4587_v36, 0.0  ;;  %v4607_v59 = vadd.f32 %v4371_v0, %v2151_v22  ;;  %v2034_v22 = vpop.f32.mrf.mxu3 }
 0x2e6   : > { %v2248_v16 = vadd.f32 %v2247_v40, %v2217_v57 }
 0x2e8   : > { %v2118_v18 = vpop.f32.mrf.mxu0 }
 0x2e9   : > { %v1938_v9 = vpop.f32.mrf.mxu2 }
 0x2ea   : > { %v2028_v21 = vadd.f32 %v2027_v1, %v1938_v9  ;;  %v4596_v1 = vadd.f32 %v4371_v0, %v2150_v5  ;;  %v1654_v9 = vadd.f32 %v4464_v10, %v4166_v19  ;;  %v1657_v19 = vadd.f32 %v4505_v15, %v4170_v14 }
 0x2eb   : > { %v2219_v14 = vmax.f32 %v4607_v59, 0.0 }
 0x2ec   : > { %v2117_v62 = vadd.f32 %v2116_v50, %v2028_v21  ;;  %v2153_v10 = vadd.f32 %v2114_v12, %v1654_v9  ;;  %v2218_v28 = vmax.f32 %v4596_v1, 0.0 }
 0x2ee   : > { %v2154_v53 = vadd.f32 %v2117_v62, %v1657_v19  ;;  %v4622_v15 = vadd.f32 %v4371_v0, %v2153_v10  ;;  %v2249_v5 = vadd.f32 %v2248_v16, %v2218_v28 }
 0x2f0   : > { %v2121_v26 = vpop.f32.mrf.mxu0  ;;  %v4629_v51 = vadd.f32 %v4371_v0, %v2154_v53  ;;  %v2250_v21 = vadd.f32 %v2249_v5, %v2219_v14  ;;  %v2221_v2 = vmax.f32 %v4622_v15, 0.0 }
 0x2f1   : > { %v1940_v44 = vpop.f32.mrf.mxu2 }
 0x2f2   : > { %v2030_v35 = vadd.f32 %v2029_v60, %v1940_v44  ;;  %v1661_v60 = vpop.f32.mrf.mxu1  ;;  %v2220_v44 = vmax.f32 %v4615_v48, 0.0  ;;  %v2222_v37 = vmax.f32 %v4629_v51, 0.0 }
 0x2f4   : > { %v2119_v50 = vadd.f32 %v2118_v18, %v2030_v35  ;;  %v1662_v18 = vadd.f32 %v1661_v60, %v4182_v31  ;;  %v2251_v35 = vadd.f32 %v2250_v21, %v2220_v44 }
 0x2f6   : > { %v2155_v52 = vadd.f32 %v2119_v50, %v1659_v43  ;;  %v2252_v13 = vadd.f32 %v2251_v35, %v2221_v2 }
 0x2f8   : > { %v4635_v31 = vadd.f32 %v4371_v0, %v2155_v52  ;;  %v2123_v62 = vpop.f32.mrf.mxu0  ;;  %v2253_v50 = vadd.f32 %v2252_v13, %v2222_v37 }
 0x2f9   : > { %v1943_v27 = vpop.f32.mrf.mxu2 }
 0x2fa   : > { %v2033_v38 = vadd.f32 %v2032_v45, %v1943_v27  ;;  %v1663_v11 = vpop.f32.mrf.mxu1  ;;  %v3225_v45 = vpop.eup %3224  ;;  %v2223_v19 = vmax.f32 %v4635_v31, 0.0 }
 0x2fb   : > { %v1664_v60 = vadd.f32 %v1663_v11, %v4899_v46  ;;  %v2264_v27 = vmul.f32 256.0, %v3225_v45  ;;  %vm2268_vm2 = vweird.f32 %v3225_v45 }
 0x2fc   : > { %v2122_v30 = vadd.f32 %v2121_v26, %v2033_v38  ;;  %v2254_v43 = vadd.f32 %v2253_v50, %v2223_v19 }
 0x2fe   : > { %v2156_v49 = vadd.f32 %v2122_v30, %v1662_v18  ;;  %v2265_v18 = vsub.f32 1.0, %v2264_v27 }
 0x300   : > { %v4641_v9 = vadd.f32 %v4371_v0, %v2156_v49  ;;  %v2266_v5 = vmul.f32 %v3225_v45, %v2265_v18 }
 0x301   : > { %v1945_v12 = vpop.f32.mrf.mxu2 }
 0x302   : > { %v2035_v63 = vadd.f32 %v2034_v22, %v1945_v12  ;;  %v2224_v40 = vmax.f32 %v4641_v9, 0.0  ;;  %v2267_v21 = vadd.f32 %v3225_v45, %v2266_v5 }
 0x304   : > { %v2124_v10 = vadd.f32 %v2123_v62, %v2035_v63  ;;  %v2255_v38 = vadd.f32 %v2254_v43, %v2224_v40  ;;  %v2269_v12 = vsel %vm2268_vm2, %v3225_v45, %v2267_v21  ;;  %v2287_v63 = vld [vmem:[%s4786_s4] sm:$0x1] }
 0x306   : > { %v2157_v26 = vadd.f32 %v2124_v10, %v1664_v60 }
 0x308   : > { %v4653_v53 = vadd.f32 %v4371_v0, %v2157_v26 }
 0x30a   : > { %v4830_v16 = vmax.f32 %v4653_v53, 0.0 }
 0x30c   : > { %v2256_v52 = vadd.f32 %v2255_v38, %v4830_v16 }
 0x30e   : > { %v2257_v30 = vrot.slane %v2256_v52, 4 }
 0x310   : > { %v2258_v49 = vadd.f32 %v2257_v30, %v2256_v52 }
 0x312   : > { %v2259_v17 = vrot.slane %v2258_v49, 2 }
 0x314   : > { %v2260_v22 = vadd.f32 %v2259_v17, %v2258_v49  ;;  %v4900_v17 = vmax.f32 %v4386_v55, 0.0 }
 0x316   : > { %v2261_v11 = vrot.slane %v2260_v22, 1 }
 0x318   : > { %v2262_v0 = vadd.f32 %v2261_v11, %v2260_v22  ;;  %v4901_v22 = vmax.f32 %v4382_v41, 0.0 }
 0x31a   : > { %v2270_v35 = vmul.f32 %v2269_v12, %v2262_v0  ;;  %v4902_v12 = vmax.f32 %v4390_v58, 0.0  ;;  %v4914_v58 = vld [vmem:[#allocation17_spill] sm:$0xff] }
 0x31c   : > { %2304 = vmatmul.f32.vlgmr.msrb.gmra.mxu1 %v2270_v35  ;;  %v4903_v35 = vld [vmem:[#allocation8_spill] sm:$0xff] }
 0x399   : > { %v2305_v62 = vpop.f32.mrf.mxu1 }
 0x39a   : > { %v2306_v13 = vadd.f32 %v2305_v62, %v2287_v63  ;;  %v4904_v63 = vmax.f32 %v4903_v35, 0.0  ;;  %v4918_v35 = vld [vmem:[#allocation13_spill] sm:$0xff] }
 0x39c   : > { %v2964_v46 = vmul.f32 -1.442695, %v2306_v13  ;;  %v4905_v13 = vld [vmem:[#allocation12_spill] sm:$0xff] }
 0x39e   : > { %3226 = vpow2.f32 %v2964_v46  ;;  %v4906_v46 = vmax.f32 %v4905_v13, 0.0 }
 0x3a4   : > { %v3227_v60 = vpop.eup %3226 }
 0x3a5   : > { %v2311_v10 = vadd.f32 1.0, %v3227_v60 }
 0x3a7   : > { %3228 = vrcp.f32 %v2311_v10  ;;  %v2323_v45 = vand.u32 2147483648, %v2311_v10  ;;  %v2321_v38 = vand.u32 2147483647, %v2311_v10  ;;  %vm2317_vm4 = vweird.f32 %v2311_v10 }
 0x3a9   : > { %v2324_v52 = vor.u32 1.1754944e-38, %v2323_v45  ;;  %vm2322_vm6 = vcmp.eq.f32.partialorder %v2321_v38, 8.507059e+37 }
 0x3ad   : > { %v3229_v50 = vpop.eup %3228 }
 0x3ae   : > { %v2313_v26 = vmul.f32 %v3229_v50, %v2311_v10  ;;  %vm2318_vm3 = vweird.f32 %v3229_v50  ;;  %v4907_v10 = vld [vmem:[#allocation10_spill] sm:$0xff] }
 0x3af   : > { %vm2319_vm5 = vmor %vm2317_vm4, %vm2318_vm3 }
 0x3b0   : > { %v2314_v27 = vsub.f32 1.0, %v2313_v26 }
 0x3b2   : > { %v2315_v43 = vmul.f32 %v3229_v50, %v2314_v27  ;;  %v4909_v27 = vld [vmem:[#allocation7_spill] sm:$0xff] }
 0x3b3   : > { %v4910_v55 = vmax.f32 %v4909_v27, 0.0  ;;  %v4922_v27 = vmax.f32 %v4487_v20, 0.0 }
 0x3b4   : > { %v2316_v18 = vadd.f32 %v3229_v50, %v2315_v43  ;;  %v4911_v43 = vld [vmem:[#allocation14_spill] sm:$0xff] }
 0x3b5   : > { %v4912_v41 = vmax.f32 %v4911_v43, 0.0 }
 0x3b6   : > { %v2320_v30 = vsel %vm2319_vm5, %v3229_v50, %v2316_v18  ;;  %v4908_v50 = vmax.f32 %v4907_v10, 0.0  ;;  %v4913_v18 = vmax.f32 %v4443_v8, 0.0  ;;  %v4923_v8 = vmax.f32 %v4494_v4, 0.0 }
 0x3b7   : > { %v2325_v5 = vsel %vm2322_vm6, %v2324_v52, %v2320_v30  ;;  %v4915_v30 = vmax.f32 %v4914_v58, 0.0 }
 0x3b8   : > { %v2327_v49 = vperm.slane %v2325_v5, 0 }
 0x3ba   : > { %v2328_v21 = vmul.f32 %v2327_v49, %v4900_v17  ;;  %v2329_v11 = vmul.f32 %v2327_v49, %v4901_v22  ;;  %v2330_v0 = vmul.f32 %v2327_v49, %v4902_v12  ;;  %v2331_v62 = vmul.f32 %v2327_v49, %v4904_v63  ;;  %v4916_v17 = vld [vmem:[#allocation16_spill] sm:$0xff] }
 0x3bb   : > { %v2332_v60 = vmul.f32 %v2327_v49, %v4906_v46  ;;  %v2333_v26 = vmul.f32 %v2327_v49, %v4908_v50  ;;  %v2334_v45 = vmul.f32 %v2327_v49, %v4910_v55  ;;  %v2335_v38 = vmul.f32 %v2327_v49, %v4912_v41  ;;  %v4920_v46 = vld [vmem:[#allocation19_spill] sm:$0xff] }
 0x3bc   : > { %v2336_v52 = vmul.f32 %v2327_v49, %v4913_v18  ;;  %v2337_v5 = vmul.f32 %v2327_v49, %v4915_v30  ;;  %v4917_v22 = vmax.f32 %v4916_v17, 0.0  ;;  %v4919_v63 = vmax.f32 %v4918_v35, 0.0 }
 0x3bd   : > { %v4921_v10 = vmax.f32 %v4920_v46, 0.0  ;;  %v2341_v55 = vmul.f32 %v2327_v49, %v4922_v27  ;;  %v3064_v43 = vpack.c.bf16 %v2329_v11, %v2328_v21  ;;  %v3069_v41 = vpack.c.bf16 %v2331_v62, %v2330_v0 }
 0x3be   : > { %v2338_v12 = vmul.f32 %v2327_v49, %v4917_v22  ;;  %v2339_v13 = vmul.f32 %v2327_v49, %v4919_v63  ;;  %v3074_v16 = vpack.c.bf16 %v2333_v26, %v2332_v60  ;;  %v2342_v18 = vmul.f32 %v2327_v49, %v4923_v8 }
 0x3bf   : > { %v2340_v50 = vmul.f32 %v2327_v49, %v4921_v10  ;;  %v2343_v58 = vmul.f32 %v2327_v49, %v2209_v39  ;;  %v3079_v30 = vpack.c.bf16 %v2335_v38, %v2334_v45  ;;  %v2344_v17 = vmul.f32 %v2327_v49, %v2210_v3  ;;  %3065 = vst [vmem:[%s4702_s8] sm:$0xff] %v3064_v43  }
 0x3c0   : > { %v2345_v22 = vmul.f32 %v2327_v49, %v2211_v24  ;;  %v3084_v4 = vpack.c.bf16 %v2337_v5, %v2336_v52  ;;  %v2346_v32 = vmul.f32 %v2327_v49, %v2212_v25  ;;  %v2347_v20 = vmul.f32 %v2327_v49, %v2213_v23  ;;  %3141 = vst [vmem:[%s4702_s8 + $0x8] sm:$0xff] %v3069_v41  }
 0x3c1   : > { %v3089_v47 = vpack.c.bf16 %v2339_v13, %v2338_v12  ;;  %v2348_v6 = vmul.f32 %v2327_v49, %v2214_v54  ;;  %v2349_v39 = vmul.f32 %v2327_v49, %v2215_v33  ;;  %3142 = vst [vmem:[%s4702_s8 + $0x10] sm:$0xff] %v3074_v16   ;;  %v3094_v3 = vpack.c.bf16 %v2341_v55, %v2340_v50 }
 0x3c2   : > { %v2350_v61 = vmul.f32 %v2327_v49, %v2216_v34  ;;  %v2351_v24 = vmul.f32 %v2327_v49, %v2217_v57  ;;  %3143 = vst [vmem:[%s4702_s8 + $0x18] sm:$0xff] %v3079_v30   ;;  %v3099_v56 = vpack.c.bf16 %v2343_v58, %v2342_v18  ;;  %v2352_v25 = vmul.f32 %v2327_v49, %v2218_v28 }
 0x3c3   : > { %v2353_v29 = vmul.f32 %v2327_v49, %v2219_v14  ;;  %3144 = vst [vmem:[%s4702_s8 + $0x20] sm:$0xff] %v3084_v4   ;;  %v3104_v23 = vpack.c.bf16 %v2345_v22, %v2344_v17  ;;  %v2354_v7 = vmul.f32 %v2327_v49, %v2220_v44  ;;  %v2355_v54 = vmul.f32 %v2327_v49, %v2221_v2 }
 0x3c4   : > { %3145 = vst [vmem:[%s4702_s8 + $0x28] sm:$0xff] %v3089_v47   ;;  %v3109_v42 = vpack.c.bf16 %v2347_v20, %v2346_v32  ;;  %v2356_v33 = vmul.f32 %v2327_v49, %v2222_v37  ;;  %v2357_v36 = vmul.f32 %v2327_v49, %v2223_v19  ;;  %v3114_v34 = vpack.c.bf16 %v2349_v39, %v2348_v6 }
 0x3c5   : > { %3146 = vst [vmem:[%s4702_s8 + $0x30] sm:$0xff] %v3094_v3   ;;  %v2358_v1 = vmul.f32 %v2327_v49, %v2224_v40  ;;  %v4924_v57 = vmax.f32 %v4653_v53, 0.0  ;;  %v3119_v28 = vpack.c.bf16 %v2351_v24, %v2350_v61  ;;  %v3124_v48 = vpack.c.bf16 %v2353_v29, %v2352_v25 }
 0x3c6   : > { %3147 = vst [vmem:[%s4702_s8 + $0x38] sm:$0xff] %v3099_v56   ;;  %v3129_v14 = vpack.c.bf16 %v2355_v54, %v2354_v7  ;;  %v3134_v15 = vpack.c.bf16 %v2357_v36, %v2356_v33 }
 0x3c7   : > { %v2359_v59 = vmul.f32 %v2327_v49, %v4924_v57  ;;  %3148 = vst [vmem:[%s4702_s8 + $0x40] sm:$0xff] %v3104_v23  }
 0x3c8   : > { %3149 = vst [vmem:[%s4702_s8 + $0x48] sm:$0xff] %v3109_v42  }
 0x3c9   : > { %3150 = vst [vmem:[%s4702_s8 + $0x50] sm:$0xff] %v3114_v34   ;;  %v3139_v44 = vpack.c.bf16 %v2359_v59, %v2358_v1 }
 0x3ca   : > { %3151 = vst [vmem:[%s4702_s8 + $0x58] sm:$0xff] %v3119_v28  }
 0x3cb   : > { %3152 = vst [vmem:[%s4702_s8 + $0x60] sm:$0xff] %v3124_v48  }
 0x3cc   : > { %3153 = vst [vmem:[%s4702_s8 + $0x68] sm:$0xff] %v3129_v14  }
 0x3cd   : > { %3154 = vst [vmem:[%s4702_s8 + $0x70] sm:$0xff] %v3134_v15  }
 0x3ce   : > { %3155 = vst [vmem:[%s4702_s8 + $0x78] sm:$0xff] %v3139_v44  }
 0x3cf   : > { %3272 = shalt.err (!%p3269_p3)
}
 0x3d0   : > { %s3310_s6 = smov 64   ;;  %s3311_s7 = smov 4  }
 0x3d1   : > { %3181 = dma.vmem_to_hbm [thread:$0]  (%p3380_p5), %s2438_s9, 2048, %s2440_s13, %s2425_s14, %s3310_s6, %s3310_s6, %s3311_s7  }
 0x3d2 PF: > { %p3187_p4 = scmp.ge.s32.totalorder %s3307_s21, 2  ;;  %s2454_s8 = sand.u32 1, %s3295_s18  }
 0x3d3   : > { %s2455_s10 = scalar_lea.sflag [#allocation3], %s2454_s8 }
 0x3d4   : > { %p3184_p7 = pnand %p3187_p4, %p3384_p6 }
 0x3d6   : > { %p3185_p8 = pneg %p3184_p7 }
 0x3d8   : > { %3290 = dma.done.wait (%p3185_p8), %s2455_s10, 2048  }
 0x3d9   : > { %3292 = vsyncadd (%p3185_p8), %s2455_s10, 4294965248  ;;  %p15_p9 = scmp.ge.s32.totalorder %s3367_s24, 4   ;;  %s4925_s18 = smov %s3299_s19 }
 0x3da   : > { %s4926_s19 = smov %s3303_s20  ;;  %s4927_s20 = smov %s3378_s27 }
 0x3db   : > { %s4928_s21 = smov %s3367_s24  ;;  %17 = sbr.rel (!%p15_p9) target bundleno = 3 (0x3), region = 77 }
 0x3e0   :  { %2461 = vsyncpa [#allocation3], 1 }
 0x3e1   :  { %2463 = vsyncpa [#allocation3 + $0x1], 1 }

</bundles_post_ra>
